<compile_context>
chip_gen: v7x
topology: tpu7x:2x2x1
jax: 0.10.0
libtpu: 0.0.40
codegen_flags: <defaults>
</compile_context>

<pallas_src>
import functools

import numpy as np

import jax
import jax.numpy as jnp
from jax import lax
from jax.experimental import pallas as pl
from jax.experimental.pallas import tpu as pltpu

KSIZE = 7
PAD = (KSIZE - 1) // 2


def _round_up(a, b):
    return (a + b - 1) // b * b


def _shift_flat(v, d):
    """s[0, i] = v[0, i + d], zero-extended (reproduces conv zero padding)."""
    n = v.shape[1]
    if d == 0:
        return v
    if abs(d) >= n:
        return jnp.zeros_like(v)
    z = jnp.zeros((1, abs(d)), v.dtype)
    if d > 0:
        return jnp.concatenate([v[:, d:], z], axis=1)
    return jnp.concatenate([z, v[:, :n + d]], axis=1)


def attention_gate_kernel(x_ref, mask_ref, w_ref, b_ref, o_ref, *,
                          C, H, W, CB, small_map):
    # x_ref   : (1, C, H*W)  VMEM  lane-dense input tile (one batch element)
    # mask_ref: (7, H*W)     VMEM  column-validity masks, one per kw offset
    # w_ref   : (2*7*7,)     SMEM  conv weights [c, kh, kw]; BN scale and the
    #                              1/C of the mean channel already folded in
    # b_ref   : (1,)         SMEM  folded BatchNorm bias
    # o_ref   : (1, C, H*W)  VMEM  output tile
    HW = H * W
    f32 = jnp.float32

    n_full = C // CB
    rem = C - n_full * CB
    unroll = True if n_full <= 8 else 2

    # --- ZPool (running channel max + channel sum), chunked over C ----------
    def fold_chunk(slab, m, s):
        slab = slab.astype(f32)
        return (jnp.maximum(m, jnp.max(slab, axis=0, keepdims=True)),
                s + jnp.sum(slab, axis=0, keepdims=True))

    z_max = jnp.full((1, HW), -jnp.inf, f32)
    z_sum = jnp.zeros((1, HW), f32)

    if n_full > 0:
        def zpool_body(i, carry):
            start = pl.multiple_of(i * CB, CB)
            return fold_chunk(x_ref[0, pl.ds(start, CB), :], *carry)
        z_max, z_sum = lax.fori_loop(0, n_full, zpool_body, (z_max, z_sum),
                                     unroll=unroll)
    if rem > 0:
        z_max, z_sum = fold_chunk(x_ref[0, pl.ds(n_full * CB, rem), :],
                                  z_max, z_sum)

    # --- 7x7 conv (2 -> 1, stride 1, pad 3, no bias) on the flat maps -------
    def masked_wshift(z, kw):
        dw = kw - PAD
        s = _shift_flat(z, dw)
        if dw != 0:
            s = s * mask_ref[pl.ds(kw, 1), :]   # zero out wrapped W columns
        return s

    if small_map:
        # Tiny maps: hoist the 14 masked W-shifts and reuse across every kh.
        sh_max = [masked_wshift(z_max, kw) for kw in range(KSIZE)]
        sh_sum = [masked_wshift(z_sum, kw) for kw in range(KSIZE)]

        def row_partial(kh):
            p = jnp.zeros((1, HW), f32)
            for kw in range(KSIZE):
                p = (p + sh_max[kw] * w_ref[kh * KSIZE + kw]
                       + sh_sum[kw] * w_ref[KSIZE * KSIZE + kh * KSIZE + kw])
            return p
    else:
        # Large maps: recompute the W-shifts per kh (XLU slot is otherwise
        # idle) to keep ~5 map-sized live values instead of ~18 (avoid spills).
        def row_partial(kh):
            p = jnp.zeros((1, HW), f32)
            for kw in range(KSIZE):
                p = (p + masked_wshift(z_max, kw) * w_ref[kh * KSIZE + kw]
                       + masked_wshift(z_sum, kw)
                         * w_ref[KSIZE * KSIZE + kh * KSIZE + kw])
            return p

    acc = jnp.zeros((1, HW), f32)
    for kh in range(KSIZE):
        acc = acc + _shift_flat(row_partial(kh), (kh - PAD) * W)

    # --- folded BatchNorm bias + sigmoid -> gating map -----------------------
    gate = jax.nn.sigmoid(acc + b_ref[0])                        # (1, HW) f32

    # --- gate the input, chunked over C, broadcast hoisted --------------------
    gate_b = jnp.broadcast_to(gate, (CB, HW))
    if n_full > 0:
        def gate_body(i, carry):
            start = pl.multiple_of(i * CB, CB)
            xs = x_ref[0, pl.ds(start, CB), :].astype(f32)
            o_ref[0, pl.ds(start, CB), :] = (xs * gate_b).astype(o_ref.dtype)
            return carry
        lax.fori_loop(0, n_full, gate_body, 0, unroll=unroll)
    if rem > 0:
        xs = x_ref[0, pl.ds(n_full * CB, rem), :].astype(f32)
        o_ref[0, pl.ds(n_full * CB, rem), :] = (
            xs * gate_b[:rem]).astype(o_ref.dtype)


def attention_gate(x, conv_w, bn_params):
    """x: (N, C, H, W), conv_w: (1, 2, 7, 7), bn_params: (2,) = [scale, bias]."""
    N, C, H, W = x.shape
    HW = H * W
    itemsize = jnp.dtype(x.dtype).itemsize

    # Fold BN scale (conv and BN scale are both linear) and 1/C of the mean
    # into the conv weights, so the kernel only adds the bias before sigmoid.
    w = conv_w.astype(jnp.float32) * bn_params[0].astype(jnp.float32)
    w = w * jnp.array([1.0, 1.0 / C], jnp.float32)[None, :, None, None]
    w_flat = w.reshape(-1)                           # (2*7*7,)
    bias = bn_params[1:2].astype(jnp.float32)        # (1,)

    # Column-validity masks for the W-direction lane shifts (conv zero pad).
    col = np.arange(HW) % W
    masks_np = np.stack(
        [((col + (kw - PAD) >= 0) & (col + (kw - PAD) < W)).astype(np.float32)
         for kw in range(KSIZE)], axis=0)
    masks = jnp.asarray(masks_np)                    # (7, H*W)

    # Lane-dense view: NCHW row-major -> (N, C, H*W) is a free reshape.
    x2 = x.reshape(N, C, HW)

    CB = min(C, 16)                                  # channels per chunk
    small_map = HW <= 512                            # hoist W-shifts only when tiny

    # Per-generation VMEM budget from the *padded* tile footprint.
    sublane = {4: 8, 2: 16, 1: 32}.get(itemsize, 8)
    padded_block = _round_up(C, sublane) * _round_up(HW, 128) * itemsize
    mask_bytes = _round_up(KSIZE, 8) * _round_up(HW, 128) * 4
    try:
        vmem_cap = getattr(pltpu.get_tpu_info(), "vmem_capacity_bytes", 64 << 20)
    except Exception:
        vmem_cap = 64 << 20                          # conservative (v7x physical)
    vmem_limit = 4 * padded_block + 2 * mask_bytes + (4 << 20)
    vmem_limit = int(min(max(vmem_limit, 32 << 20), (vmem_cap * 3) // 4))

    cost = pl.CostEstimate(
        flops=int(N * HW * (4 * C + 4 * KSIZE * KSIZE + 2)),
        transcendentals=int(N * HW),
        bytes_accessed=int(2 * N * C * HW * itemsize + KSIZE * HW * 4),
    )

    # TODO(synk): for very large C*H*W (e.g. on v7x when 4x the padded block
    # exceeds ~48 MiB), add an H-tile grid axis with a 3-row halo so the block
    # fits 64 MiB VMEM and both v7x TensorCores get work even at small N.
    kernel = functools.partial(attention_gate_kernel,
                               C=C, H=H, W=W, CB=CB, small_map=small_map)
    out = pl.pallas_call(
        kernel,
        out_shape=jax.ShapeDtypeStruct((N, C, HW), x.dtype),
        grid=(N,),
        in_specs=[
            pl.BlockSpec((1, C, HW), lambda n: (n, 0, 0)),
            pl.BlockSpec((KSIZE, HW), lambda n: (0, 0)),   # resident across grid
            pl.BlockSpec(memory_space=pltpu.MemorySpace.SMEM),
            pl.BlockSpec(memory_space=pltpu.MemorySpace.SMEM),
        ],
        out_specs=pl.BlockSpec((1, C, HW), lambda n: (n, 0, 0)),
        compiler_params=pltpu.CompilerParams(
            dimension_semantics=("parallel",),
            vmem_limit_bytes=vmem_limit,
        ),
        cost_estimate=cost,
    )(x2, masks, w_flat, bias)
    return out.reshape(N, C, H, W)


def attention_gate_reference(x, conv_w, bn_params):
    """Pure-JAX reference for correctness check."""
    z = jnp.concatenate(
        [jnp.max(x, axis=1, keepdims=True), jnp.mean(x, axis=1, keepdims=True)],
        axis=1)
    y = jax.lax.conv_general_dilated(
        z, conv_w, window_strides=(1, 1),
        padding=[(PAD, PAD), (PAD, PAD)],
        dimension_numbers=("NCHW", "OIHW", "NCHW"))
    y = y * bn_params[0] + bn_params[1]
    return x * jax.nn.sigmoid(y)


if __name__ == "__main__":
    key = jax.random.PRNGKey(0)
    kx, kw = jax.random.split(key)

    N, C, H, W = 2, 4, 16, 16
    x = jax.random.normal(kx, (N, C, H, W), dtype=jnp.float32)

    # Deterministic parameter init (synthetic; matches module shapes).
    conv_w = 0.1 * jax.random.normal(kw, (1, 2, KSIZE, KSIZE), dtype=jnp.float32)

    # BatchNorm2d(1) at default init (gamma=1, beta=0, running_mean=0,
    # running_var=1), inference form folded to a single scale/bias.
    eps = 1e-5
    gamma, beta, run_mean, run_var = 1.0, 0.0, 0.0, 1.0
    bn_scale = gamma / jnp.sqrt(run_var + eps)
    bn_bias = beta - run_mean * bn_scale
    bn_params = jnp.array([bn_scale, bn_bias], dtype=jnp.float32)

    out = attention_gate(x, conv_w, bn_params)
    out = jax.block_until_ready(out)

    ref = attention_gate_reference(x, conv_w, bn_params)
    assert out.shape == x.shape and out.dtype == x.dtype
    assert jnp.allclose(out, ref, rtol=1e-5, atol=1e-4), "mismatch vs reference"

    print("KERNEL_OK")
</pallas_src>

<mosaic_0001>
module attributes {stable_mosaic.version = 11 : i64} {
  func.func @attention_gate_kernel(%arg0: i32, %arg1: memref<1x4x256xf32, #tpu.memory_space<vmem>>, %arg2: memref<7x256xf32, #tpu.memory_space<vmem>>, %arg3: memref<98xf32, #tpu.memory_space<smem>>, %arg4: memref<1xf32, #tpu.memory_space<smem>>, %arg5: memref<1x4x256xf32, #tpu.memory_space<vmem>>) attributes {dimension_semantics = [#tpu.dimension_semantics<parallel>], iteration_bounds = array<i64: 2>, scalar_prefetch = 0 : i64, scratch_operands = 0 : i64, tpu.core_type = #tpu.core_type<tc>, window_params = [{transform_indices = @transform_0, window_bounds = array<i64: 1, 4, 256>}, {pipeline_mode = #tpu.pipeline_mode<synchronous>, transform_indices = @transform_1, window_bounds = array<i64: 7, 256>}, {transform_indices = @transform_2, window_bounds = array<i64: 98>}, {transform_indices = @transform_3, window_bounds = array<i64: 1>}, {transform_indices = @transform_4, window_bounds = array<i64: 1, 4, 256>}]} {
    %cst = arith.constant 0xFF800000 : f32
    %0 = vector.broadcast %cst : f32 to vector<1x256xf32>
    %cst_0 = arith.constant 0.000000e+00 : f32
    %1 = vector.broadcast %cst_0 : f32 to vector<1x256xf32>
    %c0_i32 = arith.constant 0 : i32
    %c4_i32 = arith.constant 4 : i32
    %2 = arith.muli %c0_i32, %c4_i32 : i32
    %3 = tpu.assume_multiple %2, 4 : i32
    %c0 = arith.constant 0 : index
    %4 = arith.index_cast %3 : i32 to index
    %c0_1 = arith.constant 0 : index
    %5 = vector.load %arg1[%c0, %4, %c0_1] : memref<1x4x256xf32, #tpu.memory_space<vmem>>, vector<1x4x256xf32>
    %6 = vector.shape_cast %5 : vector<1x4x256xf32> to vector<4x256xf32>
    %cst_2 = arith.constant dense<0xFF800000> : vector<256xf32>
    %7 = vector.multi_reduction <maximumf>, %6, %cst_2 [0] : vector<4x256xf32> to vector<256xf32>
    %8 = vector.shape_cast %7 : vector<256xf32> to vector<1x256xf32>
    %9 = arith.maximumf %0, %8 : vector<1x256xf32>
    %cst_3 = arith.constant dense<0.000000e+00> : vector<256xf32>
    %10 = vector.multi_reduction <add>, %6, %cst_3 [0] : vector<4x256xf32> to vector<256xf32>
    %11 = vector.shape_cast %10 : vector<256xf32> to vector<1x256xf32>
    %12 = arith.addf %1, %11 : vector<1x256xf32>
    %c1_i32 = arith.constant 1 : i32
    %cst_4 = arith.constant 0.000000e+00 : f32
    %13 = vector.broadcast %cst_4 : f32 to vector<1x3xf32>
    %14 = vector.extract_strided_slice %9 {offsets = [0, 0], sizes = [1, 253], strides = [1, 1]} : vector<1x256xf32> to vector<1x253xf32>
    %15 = tpu.concatenate %13, %14 in 1 : vector<1x3xf32>, vector<1x253xf32> -> vector<1x256xf32>
    %c0_5 = arith.constant 0 : index
    %c0_6 = arith.constant 0 : index
    %16 = vector.load %arg2[%c0_5, %c0_6] : memref<7x256xf32, #tpu.memory_space<vmem>>, vector<1x256xf32>
    %17 = arith.mulf %15, %16 : vector<1x256xf32>
    %cst_7 = arith.constant 0.000000e+00 : f32
    %18 = vector.broadcast %cst_7 : f32 to vector<1x2xf32>
    %19 = vector.extract_strided_slice %9 {offsets = [0, 0], sizes = [1, 254], strides = [1, 1]} : vector<1x256xf32> to vector<1x254xf32>
    %20 = tpu.concatenate %18, %19 in 1 : vector<1x2xf32>, vector<1x254xf32> -> vector<1x256xf32>
    %c1 = arith.constant 1 : index
    %c0_8 = arith.constant 0 : index
    %21 = vector.load %arg2[%c1, %c0_8] : memref<7x256xf32, #tpu.memory_space<vmem>>, vector<1x256xf32>
    %22 = arith.mulf %20, %21 : vector<1x256xf32>
    %cst_9 = arith.constant 0.000000e+00 : f32
    %23 = vector.broadcast %cst_9 : f32 to vector<1x1xf32>
    %24 = vector.extract_strided_slice %9 {offsets = [0, 0], sizes = [1, 255], strides = [1, 1]} : vector<1x256xf32> to vector<1x255xf32>
    %25 = tpu.concatenate %23, %24 in 1 : vector<1x1xf32>, vector<1x255xf32> -> vector<1x256xf32>
    %c2 = arith.constant 2 : index
    %c0_10 = arith.constant 0 : index
    %26 = vector.load %arg2[%c2, %c0_10] : memref<7x256xf32, #tpu.memory_space<vmem>>, vector<1x256xf32>
    %27 = arith.mulf %25, %26 : vector<1x256xf32>
    %cst_11 = arith.constant 0.000000e+00 : f32
    %28 = vector.broadcast %cst_11 : f32 to vector<1x1xf32>
    %29 = vector.extract_strided_slice %9 {offsets = [0, 1], sizes = [1, 255], strides = [1, 1]} : vector<1x256xf32> to vector<1x255xf32>
    %30 = tpu.concatenate %29, %28 in 1 : vector<1x255xf32>, vector<1x1xf32> -> vector<1x256xf32>
    %c4 = arith.constant 4 : index
    %c0_12 = arith.constant 0 : index
    %31 = vector.load %arg2[%c4, %c0_12] : memref<7x256xf32, #tpu.memory_space<vmem>>, vector<1x256xf32>
    %32 = arith.mulf %30, %31 : vector<1x256xf32>
    %cst_13 = arith.constant 0.000000e+00 : f32
    %33 = vector.broadcast %cst_13 : f32 to vector<1x2xf32>
    %34 = vector.extract_strided_slice %9 {offsets = [0, 2], sizes = [1, 254], strides = [1, 1]} : vector<1x256xf32> to vector<1x254xf32>
    %35 = tpu.concatenate %34, %33 in 1 : vector<1x254xf32>, vector<1x2xf32> -> vector<1x256xf32>
    %c5 = arith.constant 5 : index
    %c0_14 = arith.constant 0 : index
    %36 = vector.load %arg2[%c5, %c0_14] : memref<7x256xf32, #tpu.memory_space<vmem>>, vector<1x256xf32>
    %37 = arith.mulf %35, %36 : vector<1x256xf32>
    %cst_15 = arith.constant 0.000000e+00 : f32
    %38 = vector.broadcast %cst_15 : f32 to vector<1x3xf32>
    %39 = vector.extract_strided_slice %9 {offsets = [0, 3], sizes = [1, 253], strides = [1, 1]} : vector<1x256xf32> to vector<1x253xf32>
    %40 = tpu.concatenate %39, %38 in 1 : vector<1x253xf32>, vector<1x3xf32> -> vector<1x256xf32>
    %c6 = arith.constant 6 : index
    %c0_16 = arith.constant 0 : index
    %41 = vector.load %arg2[%c6, %c0_16] : memref<7x256xf32, #tpu.memory_space<vmem>>, vector<1x256xf32>
    %42 = arith.mulf %40, %41 : vector<1x256xf32>
    %cst_17 = arith.constant 0.000000e+00 : f32
    %43 = vector.broadcast %cst_17 : f32 to vector<1x3xf32>
    %44 = vector.extract_strided_slice %12 {offsets = [0, 0], sizes = [1, 253], strides = [1, 1]} : vector<1x256xf32> to vector<1x253xf32>
    %45 = tpu.concatenate %43, %44 in 1 : vector<1x3xf32>, vector<1x253xf32> -> vector<1x256xf32>
    %c0_18 = arith.constant 0 : index
    %c0_19 = arith.constant 0 : index
    %46 = vector.load %arg2[%c0_18, %c0_19] : memref<7x256xf32, #tpu.memory_space<vmem>>, vector<1x256xf32>
    %47 = arith.mulf %45, %46 : vector<1x256xf32>
    %cst_20 = arith.constant 0.000000e+00 : f32
    %48 = vector.broadcast %cst_20 : f32 to vector<1x2xf32>
    %49 = vector.extract_strided_slice %12 {offsets = [0, 0], sizes = [1, 254], strides = [1, 1]} : vector<1x256xf32> to vector<1x254xf32>
    %50 = tpu.concatenate %48, %49 in 1 : vector<1x2xf32>, vector<1x254xf32> -> vector<1x256xf32>
    %c1_21 = arith.constant 1 : index
    %c0_22 = arith.constant 0 : index
    %51 = vector.load %arg2[%c1_21, %c0_22] : memref<7x256xf32, #tpu.memory_space<vmem>>, vector<1x256xf32>
    %52 = arith.mulf %50, %51 : vector<1x256xf32>
    %cst_23 = arith.constant 0.000000e+00 : f32
    %53 = vector.broadcast %cst_23 : f32 to vector<1x1xf32>
    %54 = vector.extract_strided_slice %12 {offsets = [0, 0], sizes = [1, 255], strides = [1, 1]} : vector<1x256xf32> to vector<1x255xf32>
    %55 = tpu.concatenate %53, %54 in 1 : vector<1x1xf32>, vector<1x255xf32> -> vector<1x256xf32>
    %c2_24 = arith.constant 2 : index
    %c0_25 = arith.constant 0 : index
    %56 = vector.load %arg2[%c2_24, %c0_25] : memref<7x256xf32, #tpu.memory_space<vmem>>, vector<1x256xf32>
    %57 = arith.mulf %55, %56 : vector<1x256xf32>
    %cst_26 = arith.constant 0.000000e+00 : f32
    %58 = vector.broadcast %cst_26 : f32 to vector<1x1xf32>
    %59 = vector.extract_strided_slice %12 {offsets = [0, 1], sizes = [1, 255], strides = [1, 1]} : vector<1x256xf32> to vector<1x255xf32>
    %60 = tpu.concatenate %59, %58 in 1 : vector<1x255xf32>, vector<1x1xf32> -> vector<1x256xf32>
    %c4_27 = arith.constant 4 : index
    %c0_28 = arith.constant 0 : index
    %61 = vector.load %arg2[%c4_27, %c0_28] : memref<7x256xf32, #tpu.memory_space<vmem>>, vector<1x256xf32>
    %62 = arith.mulf %60, %61 : vector<1x256xf32>
    %cst_29 = arith.constant 0.000000e+00 : f32
    %63 = vector.broadcast %cst_29 : f32 to vector<1x2xf32>
    %64 = vector.extract_strided_slice %12 {offsets = [0, 2], sizes = [1, 254], strides = [1, 1]} : vector<1x256xf32> to vector<1x254xf32>
    %65 = tpu.concatenate %64, %63 in 1 : vector<1x254xf32>, vector<1x2xf32> -> vector<1x256xf32>
    %c5_30 = arith.constant 5 : index
    %c0_31 = arith.constant 0 : index
    %66 = vector.load %arg2[%c5_30, %c0_31] : memref<7x256xf32, #tpu.memory_space<vmem>>, vector<1x256xf32>
    %67 = arith.mulf %65, %66 : vector<1x256xf32>
    %cst_32 = arith.constant 0.000000e+00 : f32
    %68 = vector.broadcast %cst_32 : f32 to vector<1x3xf32>
    %69 = vector.extract_strided_slice %12 {offsets = [0, 3], sizes = [1, 253], strides = [1, 1]} : vector<1x256xf32> to vector<1x253xf32>
    %70 = tpu.concatenate %69, %68 in 1 : vector<1x253xf32>, vector<1x3xf32> -> vector<1x256xf32>
    %c6_33 = arith.constant 6 : index
    %c0_34 = arith.constant 0 : index
    %71 = vector.load %arg2[%c6_33, %c0_34] : memref<7x256xf32, #tpu.memory_space<vmem>>, vector<1x256xf32>
    %72 = arith.mulf %70, %71 : vector<1x256xf32>
    %cst_35 = arith.constant 0.000000e+00 : f32
    %73 = vector.broadcast %cst_35 : f32 to vector<1x256xf32>
    %cst_36 = arith.constant 0.000000e+00 : f32
    %74 = vector.broadcast %cst_36 : f32 to vector<1x256xf32>
    %c0_37 = arith.constant 0 : index
    %75 = memref.load %arg3[%c0_37] : memref<98xf32, #tpu.memory_space<smem>>
    %76 = vector.broadcast %75 : f32 to vector<1x256xf32>
    %77 = arith.mulf %17, %76 : vector<1x256xf32>
    %78 = arith.addf %74, %77 : vector<1x256xf32>
    %c49 = arith.constant 49 : index
    %79 = memref.load %arg3[%c49] : memref<98xf32, #tpu.memory_space<smem>>
    %80 = vector.broadcast %79 : f32 to vector<1x256xf32>
    %81 = arith.mulf %47, %80 : vector<1x256xf32>
    %82 = arith.addf %78, %81 : vector<1x256xf32>
    %c1_38 = arith.constant 1 : index
    %83 = memref.load %arg3[%c1_38] : memref<98xf32, #tpu.memory_space<smem>>
    %84 = vector.broadcast %83 : f32 to vector<1x256xf32>
    %85 = arith.mulf %22, %84 : vector<1x256xf32>
    %86 = arith.addf %82, %85 : vector<1x256xf32>
    %c50 = arith.constant 50 : index
    %87 = memref.load %arg3[%c50] : memref<98xf32, #tpu.memory_space<smem>>
    %88 = vector.broadcast %87 : f32 to vector<1x256xf32>
    %89 = arith.mulf %52, %88 : vector<1x256xf32>
    %90 = arith.addf %86, %89 : vector<1x256xf32>
    %c2_39 = arith.constant 2 : index
    %91 = memref.load %arg3[%c2_39] : memref<98xf32, #tpu.memory_space<smem>>
    %92 = vector.broadcast %91 : f32 to vector<1x256xf32>
    %93 = arith.mulf %27, %92 : vector<1x256xf32>
    %94 = arith.addf %90, %93 : vector<1x256xf32>
    %c51 = arith.constant 51 : index
    %95 = memref.load %arg3[%c51] : memref<98xf32, #tpu.memory_space<smem>>
    %96 = vector.broadcast %95 : f32 to vector<1x256xf32>
    %97 = arith.mulf %57, %96 : vector<1x256xf32>
    %98 = arith.addf %94, %97 : vector<1x256xf32>
    %c3 = arith.constant 3 : index
    %99 = memref.load %arg3[%c3] : memref<98xf32, #tpu.memory_space<smem>>
    %100 = vector.broadcast %99 : f32 to vector<1x256xf32>
    %101 = arith.mulf %9, %100 : vector<1x256xf32>
    %102 = arith.addf %98, %101 : vector<1x256xf32>
    %c52 = arith.constant 52 : index
    %103 = memref.load %arg3[%c52] : memref<98xf32, #tpu.memory_space<smem>>
    %104 = vector.broadcast %103 : f32 to vector<1x256xf32>
    %105 = arith.mulf %12, %104 : vector<1x256xf32>
    %106 = arith.addf %102, %105 : vector<1x256xf32>
    %c4_40 = arith.constant 4 : index
    %107 = memref.load %arg3[%c4_40] : memref<98xf32, #tpu.memory_space<smem>>
    %108 = vector.broadcast %107 : f32 to vector<1x256xf32>
    %109 = arith.mulf %32, %108 : vector<1x256xf32>
    %110 = arith.addf %106, %109 : vector<1x256xf32>
    %c53 = arith.constant 53 : index
    %111 = memref.load %arg3[%c53] : memref<98xf32, #tpu.memory_space<smem>>
    %112 = vector.broadcast %111 : f32 to vector<1x256xf32>
    %113 = arith.mulf %62, %112 : vector<1x256xf32>
    %114 = arith.addf %110, %113 : vector<1x256xf32>
    %c5_41 = arith.constant 5 : index
    %115 = memref.load %arg3[%c5_41] : memref<98xf32, #tpu.memory_space<smem>>
    %116 = vector.broadcast %115 : f32 to vector<1x256xf32>
    %117 = arith.mulf %37, %116 : vector<1x256xf32>
    %118 = arith.addf %114, %117 : vector<1x256xf32>
    %c54 = arith.constant 54 : index
    %119 = memref.load %arg3[%c54] : memref<98xf32, #tpu.memory_space<smem>>
    %120 = vector.broadcast %119 : f32 to vector<1x256xf32>
    %121 = arith.mulf %67, %120 : vector<1x256xf32>
    %122 = arith.addf %118, %121 : vector<1x256xf32>
    %c6_42 = arith.constant 6 : index
    %123 = memref.load %arg3[%c6_42] : memref<98xf32, #tpu.memory_space<smem>>
    %124 = vector.broadcast %123 : f32 to vector<1x256xf32>
    %125 = arith.mulf %42, %124 : vector<1x256xf32>
    %126 = arith.addf %122, %125 : vector<1x256xf32>
    %c55 = arith.constant 55 : index
    %127 = memref.load %arg3[%c55] : memref<98xf32, #tpu.memory_space<smem>>
    %128 = vector.broadcast %127 : f32 to vector<1x256xf32>
    %129 = arith.mulf %72, %128 : vector<1x256xf32>
    %130 = arith.addf %126, %129 : vector<1x256xf32>
    %cst_43 = arith.constant 0.000000e+00 : f32
    %131 = vector.broadcast %cst_43 : f32 to vector<1x48xf32>
    %132 = vector.extract_strided_slice %130 {offsets = [0, 0], sizes = [1, 208], strides = [1, 1]} : vector<1x256xf32> to vector<1x208xf32>
    %133 = tpu.concatenate %131, %132 in 1 : vector<1x48xf32>, vector<1x208xf32> -> vector<1x256xf32>
    %134 = arith.addf %73, %133 : vector<1x256xf32>
    %cst_44 = arith.constant 0.000000e+00 : f32
    %135 = vector.broadcast %cst_44 : f32 to vector<1x256xf32>
    %c7 = arith.constant 7 : index
    %136 = memref.load %arg3[%c7] : memref<98xf32, #tpu.memory_space<smem>>
    %137 = vector.broadcast %136 : f32 to vector<1x256xf32>
    %138 = arith.mulf %17, %137 : vector<1x256xf32>
    %139 = arith.addf %135, %138 : vector<1x256xf32>
    %c56 = arith.constant 56 : index
    %140 = memref.load %arg3[%c56] : memref<98xf32, #tpu.memory_space<smem>>
    %141 = vector.broadcast %140 : f32 to vector<1x256xf32>
    %142 = arith.mulf %47, %141 : vector<1x256xf32>
    %143 = arith.addf %139, %142 : vector<1x256xf32>
    %c8 = arith.constant 8 : index
    %144 = memref.load %arg3[%c8] : memref<98xf32, #tpu.memory_space<smem>>
    %145 = vector.broadcast %144 : f32 to vector<1x256xf32>
    %146 = arith.mulf %22, %145 : vector<1x256xf32>
    %147 = arith.addf %143, %146 : vector<1x256xf32>
    %c57 = arith.constant 57 : index
    %148 = memref.load %arg3[%c57] : memref<98xf32, #tpu.memory_space<smem>>
    %149 = vector.broadcast %148 : f32 to vector<1x256xf32>
    %150 = arith.mulf %52, %149 : vector<1x256xf32>
    %151 = arith.addf %147, %150 : vector<1x256xf32>
    %c9 = arith.constant 9 : index
    %152 = memref.load %arg3[%c9] : memref<98xf32, #tpu.memory_space<smem>>
    %153 = vector.broadcast %152 : f32 to vector<1x256xf32>
    %154 = arith.mulf %27, %153 : vector<1x256xf32>
    %155 = arith.addf %151, %154 : vector<1x256xf32>
    %c58 = arith.constant 58 : index
    %156 = memref.load %arg3[%c58] : memref<98xf32, #tpu.memory_space<smem>>
    %157 = vector.broadcast %156 : f32 to vector<1x256xf32>
    %158 = arith.mulf %57, %157 : vector<1x256xf32>
    %159 = arith.addf %155, %158 : vector<1x256xf32>
    %c10 = arith.constant 10 : index
    %160 = memref.load %arg3[%c10] : memref<98xf32, #tpu.memory_space<smem>>
    %161 = vector.broadcast %160 : f32 to vector<1x256xf32>
    %162 = arith.mulf %9, %161 : vector<1x256xf32>
    %163 = arith.addf %159, %162 : vector<1x256xf32>
    %c59 = arith.constant 59 : index
    %164 = memref.load %arg3[%c59] : memref<98xf32, #tpu.memory_space<smem>>
    %165 = vector.broadcast %164 : f32 to vector<1x256xf32>
    %166 = arith.mulf %12, %165 : vector<1x256xf32>
    %167 = arith.addf %163, %166 : vector<1x256xf32>
    %c11 = arith.constant 11 : index
    %168 = memref.load %arg3[%c11] : memref<98xf32, #tpu.memory_space<smem>>
    %169 = vector.broadcast %168 : f32 to vector<1x256xf32>
    %170 = arith.mulf %32, %169 : vector<1x256xf32>
    %171 = arith.addf %167, %170 : vector<1x256xf32>
    %c60 = arith.constant 60 : index
    %172 = memref.load %arg3[%c60] : memref<98xf32, #tpu.memory_space<smem>>
    %173 = vector.broadcast %172 : f32 to vector<1x256xf32>
    %174 = arith.mulf %62, %173 : vector<1x256xf32>
    %175 = arith.addf %171, %174 : vector<1x256xf32>
    %c12 = arith.constant 12 : index
    %176 = memref.load %arg3[%c12] : memref<98xf32, #tpu.memory_space<smem>>
    %177 = vector.broadcast %176 : f32 to vector<1x256xf32>
    %178 = arith.mulf %37, %177 : vector<1x256xf32>
    %179 = arith.addf %175, %178 : vector<1x256xf32>
    %c61 = arith.constant 61 : index
    %180 = memref.load %arg3[%c61] : memref<98xf32, #tpu.memory_space<smem>>
    %181 = vector.broadcast %180 : f32 to vector<1x256xf32>
    %182 = arith.mulf %67, %181 : vector<1x256xf32>
    %183 = arith.addf %179, %182 : vector<1x256xf32>
    %c13 = arith.constant 13 : index
    %184 = memref.load %arg3[%c13] : memref<98xf32, #tpu.memory_space<smem>>
    %185 = vector.broadcast %184 : f32 to vector<1x256xf32>
    %186 = arith.mulf %42, %185 : vector<1x256xf32>
    %187 = arith.addf %183, %186 : vector<1x256xf32>
    %c62 = arith.constant 62 : index
    %188 = memref.load %arg3[%c62] : memref<98xf32, #tpu.memory_space<smem>>
    %189 = vector.broadcast %188 : f32 to vector<1x256xf32>
    %190 = arith.mulf %72, %189 : vector<1x256xf32>
    %191 = arith.addf %187, %190 : vector<1x256xf32>
    %cst_45 = arith.constant 0.000000e+00 : f32
    %192 = vector.broadcast %cst_45 : f32 to vector<1x32xf32>
    %193 = vector.extract_strided_slice %191 {offsets = [0, 0], sizes = [1, 224], strides = [1, 1]} : vector<1x256xf32> to vector<1x224xf32>
    %194 = tpu.concatenate %192, %193 in 1 : vector<1x32xf32>, vector<1x224xf32> -> vector<1x256xf32>
    %195 = arith.addf %134, %194 : vector<1x256xf32>
    %cst_46 = arith.constant 0.000000e+00 : f32
    %196 = vector.broadcast %cst_46 : f32 to vector<1x256xf32>
    %c14 = arith.constant 14 : index
    %197 = memref.load %arg3[%c14] : memref<98xf32, #tpu.memory_space<smem>>
    %198 = vector.broadcast %197 : f32 to vector<1x256xf32>
    %199 = arith.mulf %17, %198 : vector<1x256xf32>
    %200 = arith.addf %196, %199 : vector<1x256xf32>
    %c63 = arith.constant 63 : index
    %201 = memref.load %arg3[%c63] : memref<98xf32, #tpu.memory_space<smem>>
    %202 = vector.broadcast %201 : f32 to vector<1x256xf32>
    %203 = arith.mulf %47, %202 : vector<1x256xf32>
    %204 = arith.addf %200, %203 : vector<1x256xf32>
    %c15 = arith.constant 15 : index
    %205 = memref.load %arg3[%c15] : memref<98xf32, #tpu.memory_space<smem>>
    %206 = vector.broadcast %205 : f32 to vector<1x256xf32>
    %207 = arith.mulf %22, %206 : vector<1x256xf32>
    %208 = arith.addf %204, %207 : vector<1x256xf32>
    %c64 = arith.constant 64 : index
    %209 = memref.load %arg3[%c64] : memref<98xf32, #tpu.memory_space<smem>>
    %210 = vector.broadcast %209 : f32 to vector<1x256xf32>
    %211 = arith.mulf %52, %210 : vector<1x256xf32>
    %212 = arith.addf %208, %211 : vector<1x256xf32>
    %c16 = arith.constant 16 : index
    %213 = memref.load %arg3[%c16] : memref<98xf32, #tpu.memory_space<smem>>
    %214 = vector.broadcast %213 : f32 to vector<1x256xf32>
    %215 = arith.mulf %27, %214 : vector<1x256xf32>
    %216 = arith.addf %212, %215 : vector<1x256xf32>
    %c65 = arith.constant 65 : index
    %217 = memref.load %arg3[%c65] : memref<98xf32, #tpu.memory_space<smem>>
    %218 = vector.broadcast %217 : f32 to vector<1x256xf32>
    %219 = arith.mulf %57, %218 : vector<1x256xf32>
    %220 = arith.addf %216, %219 : vector<1x256xf32>
    %c17 = arith.constant 17 : index
    %221 = memref.load %arg3[%c17] : memref<98xf32, #tpu.memory_space<smem>>
    %222 = vector.broadcast %221 : f32 to vector<1x256xf32>
    %223 = arith.mulf %9, %222 : vector<1x256xf32>
    %224 = arith.addf %220, %223 : vector<1x256xf32>
    %c66 = arith.constant 66 : index
    %225 = memref.load %arg3[%c66] : memref<98xf32, #tpu.memory_space<smem>>
    %226 = vector.broadcast %225 : f32 to vector<1x256xf32>
    %227 = arith.mulf %12, %226 : vector<1x256xf32>
    %228 = arith.addf %224, %227 : vector<1x256xf32>
    %c18 = arith.constant 18 : index
    %229 = memref.load %arg3[%c18] : memref<98xf32, #tpu.memory_space<smem>>
    %230 = vector.broadcast %229 : f32 to vector<1x256xf32>
    %231 = arith.mulf %32, %230 : vector<1x256xf32>
    %232 = arith.addf %228, %231 : vector<1x256xf32>
    %c67 = arith.constant 67 : index
    %233 = memref.load %arg3[%c67] : memref<98xf32, #tpu.memory_space<smem>>
    %234 = vector.broadcast %233 : f32 to vector<1x256xf32>
    %235 = arith.mulf %62, %234 : vector<1x256xf32>
    %236 = arith.addf %232, %235 : vector<1x256xf32>
    %c19 = arith.constant 19 : index
    %237 = memref.load %arg3[%c19] : memref<98xf32, #tpu.memory_space<smem>>
    %238 = vector.broadcast %237 : f32 to vector<1x256xf32>
    %239 = arith.mulf %37, %238 : vector<1x256xf32>
    %240 = arith.addf %236, %239 : vector<1x256xf32>
    %c68 = arith.constant 68 : index
    %241 = memref.load %arg3[%c68] : memref<98xf32, #tpu.memory_space<smem>>
    %242 = vector.broadcast %241 : f32 to vector<1x256xf32>
    %243 = arith.mulf %67, %242 : vector<1x256xf32>
    %244 = arith.addf %240, %243 : vector<1x256xf32>
    %c20 = arith.constant 20 : index
    %245 = memref.load %arg3[%c20] : memref<98xf32, #tpu.memory_space<smem>>
    %246 = vector.broadcast %245 : f32 to vector<1x256xf32>
    %247 = arith.mulf %42, %246 : vector<1x256xf32>
    %248 = arith.addf %244, %247 : vector<1x256xf32>
    %c69 = arith.constant 69 : index
    %249 = memref.load %arg3[%c69] : memref<98xf32, #tpu.memory_space<smem>>
    %250 = vector.broadcast %249 : f32 to vector<1x256xf32>
    %251 = arith.mulf %72, %250 : vector<1x256xf32>
    %252 = arith.addf %248, %251 : vector<1x256xf32>
    %cst_47 = arith.constant 0.000000e+00 : f32
    %253 = vector.broadcast %cst_47 : f32 to vector<1x16xf32>
    %254 = vector.extract_strided_slice %252 {offsets = [0, 0], sizes = [1, 240], strides = [1, 1]} : vector<1x256xf32> to vector<1x240xf32>
    %255 = tpu.concatenate %253, %254 in 1 : vector<1x16xf32>, vector<1x240xf32> -> vector<1x256xf32>
    %256 = arith.addf %195, %255 : vector<1x256xf32>
    %cst_48 = arith.constant 0.000000e+00 : f32
    %257 = vector.broadcast %cst_48 : f32 to vector<1x256xf32>
    %c21 = arith.constant 21 : index
    %258 = memref.load %arg3[%c21] : memref<98xf32, #tpu.memory_space<smem>>
    %259 = vector.broadcast %258 : f32 to vector<1x256xf32>
    %260 = arith.mulf %17, %259 : vector<1x256xf32>
    %261 = arith.addf %257, %260 : vector<1x256xf32>
    %c70 = arith.constant 70 : index
    %262 = memref.load %arg3[%c70] : memref<98xf32, #tpu.memory_space<smem>>
    %263 = vector.broadcast %262 : f32 to vector<1x256xf32>
    %264 = arith.mulf %47, %263 : vector<1x256xf32>
    %265 = arith.addf %261, %264 : vector<1x256xf32>
    %c22 = arith.constant 22 : index
    %266 = memref.load %arg3[%c22] : memref<98xf32, #tpu.memory_space<smem>>
    %267 = vector.broadcast %266 : f32 to vector<1x256xf32>
    %268 = arith.mulf %22, %267 : vector<1x256xf32>
    %269 = arith.addf %265, %268 : vector<1x256xf32>
    %c71 = arith.constant 71 : index
    %270 = memref.load %arg3[%c71] : memref<98xf32, #tpu.memory_space<smem>>
    %271 = vector.broadcast %270 : f32 to vector<1x256xf32>
    %272 = arith.mulf %52, %271 : vector<1x256xf32>
    %273 = arith.addf %269, %272 : vector<1x256xf32>
    %c23 = arith.constant 23 : index
    %274 = memref.load %arg3[%c23] : memref<98xf32, #tpu.memory_space<smem>>
    %275 = vector.broadcast %274 : f32 to vector<1x256xf32>
    %276 = arith.mulf %27, %275 : vector<1x256xf32>
    %277 = arith.addf %273, %276 : vector<1x256xf32>
    %c72 = arith.constant 72 : index
    %278 = memref.load %arg3[%c72] : memref<98xf32, #tpu.memory_space<smem>>
    %279 = vector.broadcast %278 : f32 to vector<1x256xf32>
    %280 = arith.mulf %57, %279 : vector<1x256xf32>
    %281 = arith.addf %277, %280 : vector<1x256xf32>
    %c24 = arith.constant 24 : index
    %282 = memref.load %arg3[%c24] : memref<98xf32, #tpu.memory_space<smem>>
    %283 = vector.broadcast %282 : f32 to vector<1x256xf32>
    %284 = arith.mulf %9, %283 : vector<1x256xf32>
    %285 = arith.addf %281, %284 : vector<1x256xf32>
    %c73 = arith.constant 73 : index
    %286 = memref.load %arg3[%c73] : memref<98xf32, #tpu.memory_space<smem>>
    %287 = vector.broadcast %286 : f32 to vector<1x256xf32>
    %288 = arith.mulf %12, %287 : vector<1x256xf32>
    %289 = arith.addf %285, %288 : vector<1x256xf32>
    %c25 = arith.constant 25 : index
    %290 = memref.load %arg3[%c25] : memref<98xf32, #tpu.memory_space<smem>>
    %291 = vector.broadcast %290 : f32 to vector<1x256xf32>
    %292 = arith.mulf %32, %291 : vector<1x256xf32>
    %293 = arith.addf %289, %292 : vector<1x256xf32>
    %c74 = arith.constant 74 : index
    %294 = memref.load %arg3[%c74] : memref<98xf32, #tpu.memory_space<smem>>
    %295 = vector.broadcast %294 : f32 to vector<1x256xf32>
    %296 = arith.mulf %62, %295 : vector<1x256xf32>
    %297 = arith.addf %293, %296 : vector<1x256xf32>
    %c26 = arith.constant 26 : index
    %298 = memref.load %arg3[%c26] : memref<98xf32, #tpu.memory_space<smem>>
    %299 = vector.broadcast %298 : f32 to vector<1x256xf32>
    %300 = arith.mulf %37, %299 : vector<1x256xf32>
    %301 = arith.addf %297, %300 : vector<1x256xf32>
    %c75 = arith.constant 75 : index
    %302 = memref.load %arg3[%c75] : memref<98xf32, #tpu.memory_space<smem>>
    %303 = vector.broadcast %302 : f32 to vector<1x256xf32>
    %304 = arith.mulf %67, %303 : vector<1x256xf32>
    %305 = arith.addf %301, %304 : vector<1x256xf32>
    %c27 = arith.constant 27 : index
    %306 = memref.load %arg3[%c27] : memref<98xf32, #tpu.memory_space<smem>>
    %307 = vector.broadcast %306 : f32 to vector<1x256xf32>
    %308 = arith.mulf %42, %307 : vector<1x256xf32>
    %309 = arith.addf %305, %308 : vector<1x256xf32>
    %c76 = arith.constant 76 : index
    %310 = memref.load %arg3[%c76] : memref<98xf32, #tpu.memory_space<smem>>
    %311 = vector.broadcast %310 : f32 to vector<1x256xf32>
    %312 = arith.mulf %72, %311 : vector<1x256xf32>
    %313 = arith.addf %309, %312 : vector<1x256xf32>
    %314 = arith.addf %256, %313 : vector<1x256xf32>
    %cst_49 = arith.constant 0.000000e+00 : f32
    %315 = vector.broadcast %cst_49 : f32 to vector<1x256xf32>
    %c28 = arith.constant 28 : index
    %316 = memref.load %arg3[%c28] : memref<98xf32, #tpu.memory_space<smem>>
    %317 = vector.broadcast %316 : f32 to vector<1x256xf32>
    %318 = arith.mulf %17, %317 : vector<1x256xf32>
    %319 = arith.addf %315, %318 : vector<1x256xf32>
    %c77 = arith.constant 77 : index
    %320 = memref.load %arg3[%c77] : memref<98xf32, #tpu.memory_space<smem>>
    %321 = vector.broadcast %320 : f32 to vector<1x256xf32>
    %322 = arith.mulf %47, %321 : vector<1x256xf32>
    %323 = arith.addf %319, %322 : vector<1x256xf32>
    %c29 = arith.constant 29 : index
    %324 = memref.load %arg3[%c29] : memref<98xf32, #tpu.memory_space<smem>>
    %325 = vector.broadcast %324 : f32 to vector<1x256xf32>
    %326 = arith.mulf %22, %325 : vector<1x256xf32>
    %327 = arith.addf %323, %326 : vector<1x256xf32>
    %c78 = arith.constant 78 : index
    %328 = memref.load %arg3[%c78] : memref<98xf32, #tpu.memory_space<smem>>
    %329 = vector.broadcast %328 : f32 to vector<1x256xf32>
    %330 = arith.mulf %52, %329 : vector<1x256xf32>
    %331 = arith.addf %327, %330 : vector<1x256xf32>
    %c30 = arith.constant 30 : index
    %332 = memref.load %arg3[%c30] : memref<98xf32, #tpu.memory_space<smem>>
    %333 = vector.broadcast %332 : f32 to vector<1x256xf32>
    %334 = arith.mulf %27, %333 : vector<1x256xf32>
    %335 = arith.addf %331, %334 : vector<1x256xf32>
    %c79 = arith.constant 79 : index
    %336 = memref.load %arg3[%c79] : memref<98xf32, #tpu.memory_space<smem>>
    %337 = vector.broadcast %336 : f32 to vector<1x256xf32>
    %338 = arith.mulf %57, %337 : vector<1x256xf32>
    %339 = arith.addf %335, %338 : vector<1x256xf32>
    %c31 = arith.constant 31 : index
    %340 = memref.load %arg3[%c31] : memref<98xf32, #tpu.memory_space<smem>>
    %341 = vector.broadcast %340 : f32 to vector<1x256xf32>
    %342 = arith.mulf %9, %341 : vector<1x256xf32>
    %343 = arith.addf %339, %342 : vector<1x256xf32>
    %c80 = arith.constant 80 : index
    %344 = memref.load %arg3[%c80] : memref<98xf32, #tpu.memory_space<smem>>
    %345 = vector.broadcast %344 : f32 to vector<1x256xf32>
    %346 = arith.mulf %12, %345 : vector<1x256xf32>
    %347 = arith.addf %343, %346 : vector<1x256xf32>
    %c32 = arith.constant 32 : index
    %348 = memref.load %arg3[%c32] : memref<98xf32, #tpu.memory_space<smem>>
    %349 = vector.broadcast %348 : f32 to vector<1x256xf32>
    %350 = arith.mulf %32, %349 : vector<1x256xf32>
    %351 = arith.addf %347, %350 : vector<1x256xf32>
    %c81 = arith.constant 81 : index
    %352 = memref.load %arg3[%c81] : memref<98xf32, #tpu.memory_space<smem>>
    %353 = vector.broadcast %352 : f32 to vector<1x256xf32>
    %354 = arith.mulf %62, %353 : vector<1x256xf32>
    %355 = arith.addf %351, %354 : vector<1x256xf32>
    %c33 = arith.constant 33 : index
    %356 = memref.load %arg3[%c33] : memref<98xf32, #tpu.memory_space<smem>>
    %357 = vector.broadcast %356 : f32 to vector<1x256xf32>
    %358 = arith.mulf %37, %357 : vector<1x256xf32>
    %359 = arith.addf %355, %358 : vector<1x256xf32>
    %c82 = arith.constant 82 : index
    %360 = memref.load %arg3[%c82] : memref<98xf32, #tpu.memory_space<smem>>
    %361 = vector.broadcast %360 : f32 to vector<1x256xf32>
    %362 = arith.mulf %67, %361 : vector<1x256xf32>
    %363 = arith.addf %359, %362 : vector<1x256xf32>
    %c34 = arith.constant 34 : index
    %364 = memref.load %arg3[%c34] : memref<98xf32, #tpu.memory_space<smem>>
    %365 = vector.broadcast %364 : f32 to vector<1x256xf32>
    %366 = arith.mulf %42, %365 : vector<1x256xf32>
    %367 = arith.addf %363, %366 : vector<1x256xf32>
    %c83 = arith.constant 83 : index
    %368 = memref.load %arg3[%c83] : memref<98xf32, #tpu.memory_space<smem>>
    %369 = vector.broadcast %368 : f32 to vector<1x256xf32>
    %370 = arith.mulf %72, %369 : vector<1x256xf32>
    %371 = arith.addf %367, %370 : vector<1x256xf32>
    %cst_50 = arith.constant 0.000000e+00 : f32
    %372 = vector.broadcast %cst_50 : f32 to vector<1x16xf32>
    %373 = vector.extract_strided_slice %371 {offsets = [0, 16], sizes = [1, 240], strides = [1, 1]} : vector<1x256xf32> to vector<1x240xf32>
    %374 = tpu.concatenate %373, %372 in 1 : vector<1x240xf32>, vector<1x16xf32> -> vector<1x256xf32>
    %375 = arith.addf %314, %374 : vector<1x256xf32>
    %cst_51 = arith.constant 0.000000e+00 : f32
    %376 = vector.broadcast %cst_51 : f32 to vector<1x256xf32>
    %c35 = arith.constant 35 : index
    %377 = memref.load %arg3[%c35] : memref<98xf32, #tpu.memory_space<smem>>
    %378 = vector.broadcast %377 : f32 to vector<1x256xf32>
    %379 = arith.mulf %17, %378 : vector<1x256xf32>
    %380 = arith.addf %376, %379 : vector<1x256xf32>
    %c84 = arith.constant 84 : index
    %381 = memref.load %arg3[%c84] : memref<98xf32, #tpu.memory_space<smem>>
    %382 = vector.broadcast %381 : f32 to vector<1x256xf32>
    %383 = arith.mulf %47, %382 : vector<1x256xf32>
    %384 = arith.addf %380, %383 : vector<1x256xf32>
    %c36 = arith.constant 36 : index
    %385 = memref.load %arg3[%c36] : memref<98xf32, #tpu.memory_space<smem>>
    %386 = vector.broadcast %385 : f32 to vector<1x256xf32>
    %387 = arith.mulf %22, %386 : vector<1x256xf32>
    %388 = arith.addf %384, %387 : vector<1x256xf32>
    %c85 = arith.constant 85 : index
    %389 = memref.load %arg3[%c85] : memref<98xf32, #tpu.memory_space<smem>>
    %390 = vector.broadcast %389 : f32 to vector<1x256xf32>
    %391 = arith.mulf %52, %390 : vector<1x256xf32>
    %392 = arith.addf %388, %391 : vector<1x256xf32>
    %c37 = arith.constant 37 : index
    %393 = memref.load %arg3[%c37] : memref<98xf32, #tpu.memory_space<smem>>
    %394 = vector.broadcast %393 : f32 to vector<1x256xf32>
    %395 = arith.mulf %27, %394 : vector<1x256xf32>
    %396 = arith.addf %392, %395 : vector<1x256xf32>
    %c86 = arith.constant 86 : index
    %397 = memref.load %arg3[%c86] : memref<98xf32, #tpu.memory_space<smem>>
    %398 = vector.broadcast %397 : f32 to vector<1x256xf32>
    %399 = arith.mulf %57, %398 : vector<1x256xf32>
    %400 = arith.addf %396, %399 : vector<1x256xf32>
    %c38 = arith.constant 38 : index
    %401 = memref.load %arg3[%c38] : memref<98xf32, #tpu.memory_space<smem>>
    %402 = vector.broadcast %401 : f32 to vector<1x256xf32>
    %403 = arith.mulf %9, %402 : vector<1x256xf32>
    %404 = arith.addf %400, %403 : vector<1x256xf32>
    %c87 = arith.constant 87 : index
    %405 = memref.load %arg3[%c87] : memref<98xf32, #tpu.memory_space<smem>>
    %406 = vector.broadcast %405 : f32 to vector<1x256xf32>
    %407 = arith.mulf %12, %406 : vector<1x256xf32>
    %408 = arith.addf %404, %407 : vector<1x256xf32>
    %c39 = arith.constant 39 : index
    %409 = memref.load %arg3[%c39] : memref<98xf32, #tpu.memory_space<smem>>
    %410 = vector.broadcast %409 : f32 to vector<1x256xf32>
    %411 = arith.mulf %32, %410 : vector<1x256xf32>
    %412 = arith.addf %408, %411 : vector<1x256xf32>
    %c88 = arith.constant 88 : index
    %413 = memref.load %arg3[%c88] : memref<98xf32, #tpu.memory_space<smem>>
    %414 = vector.broadcast %413 : f32 to vector<1x256xf32>
    %415 = arith.mulf %62, %414 : vector<1x256xf32>
    %416 = arith.addf %412, %415 : vector<1x256xf32>
    %c40 = arith.constant 40 : index
    %417 = memref.load %arg3[%c40] : memref<98xf32, #tpu.memory_space<smem>>
    %418 = vector.broadcast %417 : f32 to vector<1x256xf32>
    %419 = arith.mulf %37, %418 : vector<1x256xf32>
    %420 = arith.addf %416, %419 : vector<1x256xf32>
    %c89 = arith.constant 89 : index
    %421 = memref.load %arg3[%c89] : memref<98xf32, #tpu.memory_space<smem>>
    %422 = vector.broadcast %421 : f32 to vector<1x256xf32>
    %423 = arith.mulf %67, %422 : vector<1x256xf32>
    %424 = arith.addf %420, %423 : vector<1x256xf32>
    %c41 = arith.constant 41 : index
    %425 = memref.load %arg3[%c41] : memref<98xf32, #tpu.memory_space<smem>>
    %426 = vector.broadcast %425 : f32 to vector<1x256xf32>
    %427 = arith.mulf %42, %426 : vector<1x256xf32>
    %428 = arith.addf %424, %427 : vector<1x256xf32>
    %c90 = arith.constant 90 : index
    %429 = memref.load %arg3[%c90] : memref<98xf32, #tpu.memory_space<smem>>
    %430 = vector.broadcast %429 : f32 to vector<1x256xf32>
    %431 = arith.mulf %72, %430 : vector<1x256xf32>
    %432 = arith.addf %428, %431 : vector<1x256xf32>
    %cst_52 = arith.constant 0.000000e+00 : f32
    %433 = vector.broadcast %cst_52 : f32 to vector<1x32xf32>
    %434 = vector.extract_strided_slice %432 {offsets = [0, 32], sizes = [1, 224], strides = [1, 1]} : vector<1x256xf32> to vector<1x224xf32>
    %435 = tpu.concatenate %434, %433 in 1 : vector<1x224xf32>, vector<1x32xf32> -> vector<1x256xf32>
    %436 = arith.addf %375, %435 : vector<1x256xf32>
    %cst_53 = arith.constant 0.000000e+00 : f32
    %437 = vector.broadcast %cst_53 : f32 to vector<1x256xf32>
    %c42 = arith.constant 42 : index
    %438 = memref.load %arg3[%c42] : memref<98xf32, #tpu.memory_space<smem>>
    %439 = vector.broadcast %438 : f32 to vector<1x256xf32>
    %440 = arith.mulf %17, %439 : vector<1x256xf32>
    %441 = arith.addf %437, %440 : vector<1x256xf32>
    %c91 = arith.constant 91 : index
    %442 = memref.load %arg3[%c91] : memref<98xf32, #tpu.memory_space<smem>>
    %443 = vector.broadcast %442 : f32 to vector<1x256xf32>
    %444 = arith.mulf %47, %443 : vector<1x256xf32>
    %445 = arith.addf %441, %444 : vector<1x256xf32>
    %c43 = arith.constant 43 : index
    %446 = memref.load %arg3[%c43] : memref<98xf32, #tpu.memory_space<smem>>
    %447 = vector.broadcast %446 : f32 to vector<1x256xf32>
    %448 = arith.mulf %22, %447 : vector<1x256xf32>
    %449 = arith.addf %445, %448 : vector<1x256xf32>
    %c92 = arith.constant 92 : index
    %450 = memref.load %arg3[%c92] : memref<98xf32, #tpu.memory_space<smem>>
    %451 = vector.broadcast %450 : f32 to vector<1x256xf32>
    %452 = arith.mulf %52, %451 : vector<1x256xf32>
    %453 = arith.addf %449, %452 : vector<1x256xf32>
    %c44 = arith.constant 44 : index
    %454 = memref.load %arg3[%c44] : memref<98xf32, #tpu.memory_space<smem>>
    %455 = vector.broadcast %454 : f32 to vector<1x256xf32>
    %456 = arith.mulf %27, %455 : vector<1x256xf32>
    %457 = arith.addf %453, %456 : vector<1x256xf32>
    %c93 = arith.constant 93 : index
    %458 = memref.load %arg3[%c93] : memref<98xf32, #tpu.memory_space<smem>>
    %459 = vector.broadcast %458 : f32 to vector<1x256xf32>
    %460 = arith.mulf %57, %459 : vector<1x256xf32>
    %461 = arith.addf %457, %460 : vector<1x256xf32>
    %c45 = arith.constant 45 : index
    %462 = memref.load %arg3[%c45] : memref<98xf32, #tpu.memory_space<smem>>
    %463 = vector.broadcast %462 : f32 to vector<1x256xf32>
    %464 = arith.mulf %9, %463 : vector<1x256xf32>
    %465 = arith.addf %461, %464 : vector<1x256xf32>
    %c94 = arith.constant 94 : index
    %466 = memref.load %arg3[%c94] : memref<98xf32, #tpu.memory_space<smem>>
    %467 = vector.broadcast %466 : f32 to vector<1x256xf32>
    %468 = arith.mulf %12, %467 : vector<1x256xf32>
    %469 = arith.addf %465, %468 : vector<1x256xf32>
    %c46 = arith.constant 46 : index
    %470 = memref.load %arg3[%c46] : memref<98xf32, #tpu.memory_space<smem>>
    %471 = vector.broadcast %470 : f32 to vector<1x256xf32>
    %472 = arith.mulf %32, %471 : vector<1x256xf32>
    %473 = arith.addf %469, %472 : vector<1x256xf32>
    %c95 = arith.constant 95 : index
    %474 = memref.load %arg3[%c95] : memref<98xf32, #tpu.memory_space<smem>>
    %475 = vector.broadcast %474 : f32 to vector<1x256xf32>
    %476 = arith.mulf %62, %475 : vector<1x256xf32>
    %477 = arith.addf %473, %476 : vector<1x256xf32>
    %c47 = arith.constant 47 : index
    %478 = memref.load %arg3[%c47] : memref<98xf32, #tpu.memory_space<smem>>
    %479 = vector.broadcast %478 : f32 to vector<1x256xf32>
    %480 = arith.mulf %37, %479 : vector<1x256xf32>
    %481 = arith.addf %477, %480 : vector<1x256xf32>
    %c96 = arith.constant 96 : index
    %482 = memref.load %arg3[%c96] : memref<98xf32, #tpu.memory_space<smem>>
    %483 = vector.broadcast %482 : f32 to vector<1x256xf32>
    %484 = arith.mulf %67, %483 : vector<1x256xf32>
    %485 = arith.addf %481, %484 : vector<1x256xf32>
    %c48 = arith.constant 48 : index
    %486 = memref.load %arg3[%c48] : memref<98xf32, #tpu.memory_space<smem>>
    %487 = vector.broadcast %486 : f32 to vector<1x256xf32>
    %488 = arith.mulf %42, %487 : vector<1x256xf32>
    %489 = arith.addf %485, %488 : vector<1x256xf32>
    %c97 = arith.constant 97 : index
    %490 = memref.load %arg3[%c97] : memref<98xf32, #tpu.memory_space<smem>>
    %491 = vector.broadcast %490 : f32 to vector<1x256xf32>
    %492 = arith.mulf %72, %491 : vector<1x256xf32>
    %493 = arith.addf %489, %492 : vector<1x256xf32>
    %cst_54 = arith.constant 0.000000e+00 : f32
    %494 = vector.broadcast %cst_54 : f32 to vector<1x48xf32>
    %495 = vector.extract_strided_slice %493 {offsets = [0, 48], sizes = [1, 208], strides = [1, 1]} : vector<1x256xf32> to vector<1x208xf32>
    %496 = tpu.concatenate %495, %494 in 1 : vector<1x208xf32>, vector<1x48xf32> -> vector<1x256xf32>
    %497 = arith.addf %436, %496 : vector<1x256xf32>
    %c0_55 = arith.constant 0 : index
    %498 = memref.load %arg4[%c0_55] : memref<1xf32, #tpu.memory_space<smem>>
    %499 = vector.broadcast %498 : f32 to vector<1x256xf32>
    %500 = arith.addf %497, %499 : vector<1x256xf32>
    %501 = arith.negf %500 : vector<1x256xf32>
    %502 = math.exp %501 : vector<1x256xf32>
    %cst_56 = arith.constant 1.000000e+00 : f32
    %503 = vector.broadcast %cst_56 : f32 to vector<1x256xf32>
    %504 = arith.addf %503, %502 : vector<1x256xf32>
    %505 = arith.divf %503, %504 : vector<1x256xf32>
    %506 = vector.shape_cast %505 : vector<1x256xf32> to vector<1x256xf32>
    %507 = vector.broadcast %506 : vector<1x256xf32> to vector<4x256xf32>
    %c0_i32_57 = arith.constant 0 : i32
    %c4_i32_58 = arith.constant 4 : i32
    %508 = arith.muli %c0_i32_57, %c4_i32_58 : i32
    %509 = tpu.assume_multiple %508, 4 : i32
    %c0_59 = arith.constant 0 : index
    %510 = arith.index_cast %509 : i32 to index
    %c0_60 = arith.constant 0 : index
    %511 = vector.load %arg1[%c0_59, %510, %c0_60] : memref<1x4x256xf32, #tpu.memory_space<vmem>>, vector<1x4x256xf32>
    %512 = vector.shape_cast %511 : vector<1x4x256xf32> to vector<4x256xf32>
    %513 = arith.mulf %512, %507 : vector<4x256xf32>
    %c0_61 = arith.constant 0 : index
    %514 = arith.index_cast %509 : i32 to index
    %c0_62 = arith.constant 0 : index
    %515 = vector.load %arg5[%c0_61, %514, %c0_62] : memref<1x4x256xf32, #tpu.memory_space<vmem>>, vector<1x4x256xf32>
    %516 = vector.shape_cast %515 : vector<1x4x256xf32> to vector<4x256xf32>
    %517 = vector.shape_cast %513 : vector<4x256xf32> to vector<1x4x256xf32>
    tpu.vector_store %arg5[%c0_61, %514, %c0_62], %517 {strides = array<i32>} : memref<1x4x256xf32, #tpu.memory_space<vmem>>, vector<1x4x256xf32>,
    %c1_i32_63 = arith.constant 1 : i32
    return
  }
  func.func @transform_0(%arg0: i32) -> (i32, i32, i32) {
    %c0_i32 = arith.constant 0 : i32
    %c0_i32_0 = arith.constant 0 : i32
    %c0_i32_1 = arith.constant 0 : i32
    return %arg0, %c0_i32, %c0_i32_0 : i32, i32, i32
  }
  func.func @transform_1(%arg0: i32) -> (i32, i32) {
    %c0_i32 = arith.constant 0 : i32
    %c0_i32_0 = arith.constant 0 : i32
    %c0_i32_1 = arith.constant 0 : i32
    return %c0_i32, %c0_i32_0 : i32, i32
  }
  func.func @transform_2(%arg0: i32) -> i32 {
    %c0_i32 = arith.constant 0 : i32
    %c0_i32_0 = arith.constant 0 : i32
    return %c0_i32 : i32
  }
  func.func @transform_3(%arg0: i32) -> i32 {
    %c0_i32 = arith.constant 0 : i32
    %c0_i32_0 = arith.constant 0 : i32
    return %c0_i32 : i32
  }
  func.func @transform_4(%arg0: i32) -> (i32, i32, i32) {
    %c0_i32 = arith.constant 0 : i32
    %c0_i32_0 = arith.constant 0 : i32
    %c0_i32_1 = arith.constant 0 : i32
    return %arg0, %c0_i32, %c0_i32_0 : i32, i32, i32
  }
}

</mosaic_0001>

<bundles_post_ra>
// kernel: tpu_custom_call.1
= control target key start
LH: loop header
LB: loop body
LE: loop exit
PB: predicated region body
PF: predicated region fallthrough
CT: control target
= control target key end

     0   :  { %s3030_s0 = inlined_call_operand.hbm [shape: f32[2,4,256], index: 0, kind: input, shape index: {}]   ;;  %s3031_s1 = inlined_call_operand.hbm [shape: f32[7,256], index: 1, kind: input, shape index: {}]   ;;  %s3032_s2 = inlined_call_operand.vmem [shape: f32[98], index: 2, kind: input, shape index: {}]   ;;  %s3033_s3 = inlined_call_operand.<no memory space> [shape: f32[1], index: 3, kind: input, shape index: {}]   ;;  %s3034_s4 = inlined_call_operand.hbm [shape: f32[2,4,256], index: 4, kind: output, shape index: {}]  }
   0x1   :  { %3197 = sst [smem:[#allocation124_spill]] %s3030_s0 }
   0x2   :  { %3198 = sst [smem:[#allocation125_spill]] %s3031_s1 }
   0x3   :  { %3199 = sst [smem:[#allocation126_spill]] %s3032_s2 }
   0x4   :  { %3200 = sst [smem:[#allocation127_spill]] %s3034_s4 }
   0x5   :  { %9 = sst [smem:[#allocation2]] %s3033_s3 }
   0x6   :  { %10 = vsyncpa [#allocation4], 0 }
   0x7   :  { %12 = vsyncpa [#allocation4 + $0x1], 0 }
   0x8   :  { %13 = vsyncpa [#allocation8], 0 }
   0x9   :  { %14 = vsyncpa [#allocation6], 0 }
   0xa   :  { %15 = vsyncpa [#allocation5], 0 }
   0xb   :  { %17 = vsyncpa [#allocation5 + $0x1], 0  ;;  %s1695_s17 = smov 0   ;;  %s1697_s18 = smov 0  }
   0xc   :  { %s1699_s19 = smov 0   ;;  %s1701_s20 = smov 0  }
   0xd LB: > { %3201 = sst [smem:[#allocation15_spill]] %s1637_s17  ;;  %s1716_s3 = sadd.s32 4294967295, %s1649_s20   ;;  %s1649_s20 = sphi %s1701_s20, %s3610_s20   ;;  %s1645_s19 = sphi %s1699_s19, %s3613_s19   ;;  %s1641_s18 = sphi %s1697_s18, %s3612_s18   ;;  %s1637_s17 = sphi %s1695_s17, %s3611_s17  }
   0xe   : > { %3202 = sst [smem:[#allocation16_spill]] %s1641_s18  ;;  %s1294_s21 = sadd.s32 4294967294, %s1649_s20  }
   0xf   : > { %3203 = sst [smem:[#allocation17_spill]] %s1645_s19  ;;  %p43_p0 = scmp.ne.s32.totalorder %s1641_s18, %s1637_s17 }
  0x10   : > { %3204 = sst [smem:[#allocation18_spill]] %s1649_s20  ;;  %p3035_p1 = scmp.eq.s32.totalorder %s1716_s3, 0 }
  0x11   : > { %3205 = sst [smem:[#allocation19_spill]] %s1716_s3  ;;  %p136_p3 = scmp.eq.s32.totalorder %s1294_s21, 1 }
  0x12   : > { %p1725_p4 = por %p3035_p1, %p43_p0  ;;  %p1295_p5 = scmp.ge.s32.totalorder %s1649_s20, 1 }
  0x13   : > { %p1730_p6 = por %p136_p3, %p43_p0  ;;  %p143_p7 = scmp.lt.s32.totalorder %s1649_s20, 3 }
  0x14   : > { %s3206_s22 = scalar_select %p1725_p4, 1, 0 }
  0x15   : > { %s3207_s23 = scalar_select %p1730_p6, 1, 0 }
  0x16   : > { %p1735_p8 = pnand %p1295_p5, %p143_p7  ;;  %s1651_s25 = smov [#allocation7]  }
  0x17   : > { %3208 = sst [smem:[#allocation20_spill]] %s3207_s23  ;;  %s156_s26 = sshll.u32 %s1651_s25, 4  ;;  %s157_s26 = int_to_ptr.vmem [resolvable:$true] %s156_s26 }
  0x18   : > { %s3209_s24 = scalar_select %p1735_p8, 1, 0 }
  0x19   : > { %p1425_p10 = pneg %p1735_p8  ;;  %s3210_s2 = sld [smem:[#allocation126_spill]] }
  0x1a   : > { %s1754_s5 = sadd.s32 1, %s1649_s20   ;;  %s3213_s1 = sld [smem:[#allocation125_spill]] }
  0x1b   : > { %p1749_p11 = pnand %p1425_p10, %p3035_p1  ;;  %3212 = sst [smem:[#allocation21_spill]] %s1754_s5 }
  0x1c   : > { %s27_s6 = ssub.s32 %s1649_s20, %s1754_s5 }
  0x1d   : > { %p1504_p13 = pneg %p1749_p11 }
  0x1f   : > { %s167_s29 = sshll.u32 %s3210_s2, 4  ;;  %s1745_s29 = int_to_ptr.vmem [resolvable:$true] %s167_s29 }
  0x20   : > { %s1502_s9 = scalar_lea.hbm %s3213_s1, 256 }
  0x21   : > { %p1503_p12 = scmp.ne.s32.totalorder %s3213_s1, %s1502_s9  ;;  %p1509_p5 = scmp.lt.u32.totalorder %s1502_s9, %s3213_s1 }
  0x23   : > { %p1505_p0 = pnand %p1504_p13, %p1503_p12 }
  0x25   : > { %p1506_p3 = pneg %p1505_p0 }
  0x27   : > { %p1511_p7 = pnand %p1509_p5, %p1506_p3 }
  0x29   : > { %1514 = shalt.err (!%p1511_p7)
}
  0x2a   : > { %s1515_s14 = scalar_lea.vmem %s157_s26, 256  ;;  %p1523_p2 = scmp.lt.s32.totalorder %s157_s26, %s157_s26 }
  0x2b   : > { %p1516_p10 = scmp.ne.s32.totalorder %s157_s26, %s1515_s14  ;;  %p1524_p6 = scmp.lt.s32.totalorder %s1515_s14, %s1515_s14 }
  0x2d   : > { %p1518_p9 = pnand %p1516_p10, %p1504_p13  ;;  %p1525_p4 = por %p1524_p6, %p1523_p2 }
  0x2f   : > { %p1519_p1 = pneg %p1518_p9 }
  0x31   : > { %p1526_p8 = pnand %p1525_p4, %p1519_p1 }
  0x33   : > { %1529 = shalt.err (!%p1526_p8)
}
  0x34   : > { %1428 = dma.hbm_to_vmem [thread:$0]  (!%p1749_p11), %s3213_s1, 256, %s157_s26, [#allocation8]  }
  0x35   : > { %s1530_s21 = scalar_lea.vmem %s1745_s29, 16  ;;  %p1538_p2 = scmp.lt.s32.totalorder %s1745_s29, %s1745_s29 }
  0x36   : > { %p1531_p12 = scmp.ne.s32.totalorder %s1745_s29, %s1530_s21  ;;  %p1539_p1 = scmp.lt.s32.totalorder %s1530_s21, %s1530_s21 }
  0x38   : > { %p1533_p9 = pnand %p1531_p12, %p1504_p13  ;;  %p1540_p4 = por %p1539_p1, %p1538_p2 }
  0x3a   : > { %p1534_p0 = pneg %p1533_p9 }
  0x3c   : > { %p1541_p6 = pnand %p1540_p4, %p1534_p0 }
  0x3e   : > { %1544 = shalt.err (!%p1541_p6)
}
  0x3f   : > { %s1652_s25 = smov [#allocation9]   ;;  %p28_p8 = scmp.eq.s32.totalorder %s27_s6, 0 }
  0x40   : > { %1431 = dma.vmem_to_smem (!%p1749_p11), %s1745_s29, 16, %s1652_s25, [#allocation6]  }
  0x41   : > { %s30_s26 = sadd.s32 1, %s1645_s19  ;;  %p37_p13 = scmp.ne.s32.totalorder %s1645_s19, %s1641_s18 }
  0x42   : > { %p38_p3 = scmp.eq.s32.totalorder %s1649_s20, 0  ;;  %p3215_p7 = scmp.eq.s32.totalorder %s1716_s3, 1 }
  0x43   : > { %s1798_s27 = scalar_select %p28_p8, %s1645_s19, %s30_s26  }
  0x44   : > { %p39_p5 = por %p38_p3, %p37_p13  ;;  %p1802_p10 = por %p3215_p7, %p37_p13 }
  0x45   : > { %3214 = sst [smem:[#allocation22_spill]] %s1798_s27  ;;  %p1442_p12 = scmp.lt.s32.totalorder %s1649_s20, 2 }
  0x46   : > { %s3216_s28 = scalar_select %p1802_p10, 1, 0 }
  0x47   : > { %s181_s30 = sand.u32 1, %s1645_s19   ;;  %s1411_s8 = sshll.u32 %s1649_s20, 7 }
  0x48   : > { %3217 = sst [smem:[#allocation23_spill]] %s3216_s28  ;;  %s1299_s7 = sshll.u32 %s181_s30, 3 }
  0x49   : > { %s3218_s0 = sld [smem:[#allocation124_spill]]  ;;  %s185_s6 = scalar_lea.vmem [#allocation3], %s1299_s7 }
  0x4a   : > { %s193_s11 = sshll.u32 %s185_s6, 4  ;;  %p1816_p11 = pnand %p1442_p12, %p39_p5  ;;  %s1814_s11 = int_to_ptr.vmem [resolvable:$true] %s193_s11 }
  0x4b   : > { %s182_s13 = scalar_lea.sflag [#allocation4], %s181_s30 }
  0x4c   : > { %p1547_p0 = pneg %p1816_p11 }
  0x4f   : > { %s1812_s29 = scalar_lea.hbm %s3218_s0, %s1411_s8  ;;  %s1550_s21 = scalar_lea.hbm %s3218_s0, 256 }
  0x50   : > { %s1545_s14 = scalar_lea.hbm %s1812_s29, 128  ;;  %p1551_p4 = scmp.lt.u32.totalorder %s1812_s29, %s3218_s0 }
  0x51   : > { %p1546_p9 = scmp.ne.s32.totalorder %s1812_s29, %s1545_s14  ;;  %p1552_p6 = scmp.lt.u32.totalorder %s1550_s21, %s1545_s14 }
  0x52   : > { %p1554_p13 = scmp.lt.u32.totalorder %s1545_s14, %s1812_s29 }
  0x53   : > { %p1548_p2 = pnand %p1547_p0, %p1546_p9  ;;  %p1553_p8 = por %p1552_p6, %p1551_p4 }
  0x55   : > { %p1549_p1 = pneg %p1548_p2  ;;  %p1555_p3 = por %p1554_p13, %p1553_p8 }
  0x57   : > { %p1556_p5 = pnand %p1555_p3, %p1549_p1 }
  0x59   : > { %1559 = shalt.err (!%p1556_p5)
}
  0x5a   : > { %s1560_s30 = scalar_lea.vmem %s1814_s11, 128  ;;  %s1653_s7 = smov [#allocation3]  }
  0x5b   : > { %p1561_p7 = scmp.ne.s32.totalorder %s1814_s11, %s1560_s30  ;;  %s1565_s8 = sshll.u32 %s1653_s7, 4  ;;  %s1566_s8 = int_to_ptr.vmem [resolvable:$false] %s1565_s8 }
  0x5c   : > { %s1567_s9 = scalar_lea.vmem %s1566_s8, 256  ;;  %p1568_p2 = scmp.lt.s32.totalorder %s1814_s11, %s1566_s8 }
  0x5d   : > { %p1563_p12 = pnand %p1561_p7, %p1547_p0  ;;  %p1569_p4 = scmp.lt.s32.totalorder %s1567_s9, %s1560_s30 }
  0x5f   : > { %p1564_p9 = pneg %p1563_p12  ;;  %p1570_p6 = por %p1569_p4, %p1568_p2 }
  0x61   : > { %p1571_p8 = pnand %p1570_p6, %p1564_p9 }
  0x63   : > { %1574 = shalt.err (!%p1571_p8)
}
  0x64   : > { %1435 = dma.hbm_to_vmem [thread:$0]  (!%p1816_p11), %s1812_s29, 128, %s1814_s11, %s182_s13  }
  0x65   : > { %p3220_p1 = scmp.ne.s32.totalorder %s3209_s24, 0 }
  0x67   : > { %202 = sbr.rel (%p3220_p1) target bundleno = 559 (0x22f), region = 36 }
  0x6e   : > { %s1848_s10 = sand.u32 1, %s1641_s18   ;;  %p3223_p0 = scmp.ne.s32.totalorder %s3206_s22, 0 }
  0x6f   : > { %3221 = sst [smem:[#allocation24_spill]] %s1848_s10  ;;  %s3038_s6 = sshll.u32 %s1848_s10, 3 }
  0x70   : > { %s205_s14 = scalar_lea.sflag [#allocation4], %s1848_s10  ;;  %s1854_s15 = scalar_lea.vmem [#allocation3], %s3038_s6 }
  0x71   : > { %3222 = sst [smem:[#allocation25_spill]] %s1854_s15 }
  0x72   : > { %1620 = dma.done.wait (%p3223_p0), %s205_s14, 128  }
  0x73   : > { %1622 = vsyncadd (%p3223_p0), %s205_s14, 4294967168  ;;  %p3224_p11 = scmp.eq.s32.totalorder %s1716_s3, 0 }
  0x75   : > { %1624 = dma.done.wait (%p3224_p11), [#allocation8], 256   ;;  %p3225_p13 = pmov %p3224_p11 }
  0x76   : > { %p3226_p3 = pmov %p3224_p11 }
  0x77   : > { %1626 = vsyncadd (%p3225_p13), [#allocation8], 4294967040 }
  0x78   : > { %1628 = dma.done.wait (%p3226_p3), [#allocation6], 16   ;;  %p3227_p5 = pmov %p3226_p3 }
  0x7a   : > { %1630 = vsyncadd (%p3227_p5), [#allocation6], 4294967280 }
  0x7b   : > { %221 = sfence }
  0x7c   : > { %v245_v0 = vld [vmem:[%s1854_s15] sm:$0xff]  ;;  %vm249_vm0 = vcmask 1043456   ;;  %s1654_s22 = smov 3   ;;  %s1655_s24 = smov 2   ;;  %v293_v30 = vlaneseq  ;;  %vm286_vm1 = vcmask 23552   ;;  %vm309_vm2 = vcmask 15360  }
  0x7d   : > { %v264_v1 = vsel %vm249_vm0, %v245_v0, 0.0  ;;  %v250_v2 = vsel %vm249_vm0, %v245_v0, -inf  ;;  %v247_v3 = vcombine.high %v245_v0, %v245_v0  ;;  %s1656_s29 = smov 1   ;;  %s1657_s11 = smov 127   ;;  %vm333_vm3 = vcmask 7168  }
  0x7e   : > { %v265_v4 = vrot.slane %v264_v1, 4  ;;  %v251_v5 = vrot.slane %v250_v2, 4  ;;  %s1658_s12 = smov 126   ;;  %s1659_s13 = smov 125   ;;  %v294_v31 = vshrl.u32 %v293_v30, 7  ;;  %vm357_vm4 = vcmask 1039360  }
  0x7f   : > { %v271_v6 = vsel %vm249_vm0, %v247_v3, 0.0  ;;  %v257_v7 = vsel %vm249_vm0, %v247_v3, -inf  ;;  %s1901_s16 = sld [smem:[#allocation9 + $0x31]]  ;;  %s1903_s21 = sld [smem:[#allocation9 + $0x38]]  ;;  %vm381_vm5 = vcmask 1031168   ;;  %vm405_vm6 = vcmask 1022976  }
  0x80   : > { %v266_v8 = vadd.f32 %v265_v4, %v264_v1  ;;  %v252_v9 = vmax.f32 %v250_v2, %v251_v5  ;;  %v272_v10 = vrot.slane %v271_v6, 4  ;;  %v258_v11 = vrot.slane %v257_v7, 4  ;;  %s1905_s25 = sld [smem:[#allocation9 + $0x3f]]  ;;  %s1907_s26 = sld [smem:[#allocation9 + $0x46]] }
  0x81   : > { %s1909_s30 = sld [smem:[#allocation9 + $0x4d]]  ;;  %s1911_s7 = sld [smem:[#allocation9 + $0x54]]  ;;  %v291_v32 = vld [vmem:[#allocation7] ss:$8 sm:$0x3]  ;;  %v1965_v33 = vsub.s32 0, %v294_v31 }
  0x82   : > { %v267_v12 = vrot.slane %v266_v8, 2  ;;  %v253_v13 = vrot.slane %v252_v9, 2  ;;  %v273_v14 = vadd.f32 %v272_v10, %v271_v6  ;;  %v259_v15 = vmax.f32 %v257_v7, %v258_v11  ;;  %s1913_s8 = sld [smem:[#allocation9 + $0x5b]]  ;;  %s1915_s9 = sld [smem:[#allocation9]] }
  0x83   : > { %s1917_s14 = sld [smem:[#allocation9 + $0x7]]  ;;  %s1931_s6 = sld [smem:[#allocation9 + $0x8]]  ;;  %3261 = vst [vmem:[#allocation59_spill] sm:$0xff] %v1965_v33  ;;  %v1967_v34 = vsub.s32 1, %v294_v31  ;;  %v1986_v36 = vrot.slane %v291_v32, %v1965_v33  ;;  %vm674_vm7 = vcmask 261120   ;;  %vm577_vm8 = vcmask 392192  }
  0x84   : > { %v268_v16 = vadd.f32 %v267_v12, %v266_v8  ;;  %v254_v17 = vmax.f32 %v252_v9, %v253_v13  ;;  %v274_v18 = vrot.slane %v273_v14, 2  ;;  %v260_v19 = vrot.slane %v259_v15, 2  ;;  %s1933_s0 = sld [smem:[#allocation9 + $0xf]]  ;;  %s1935_s1 = sld [smem:[#allocation9 + $0x16]] }
  0x85   : > { %3229 = sst [smem:[#allocation27_spill]] %s1901_s16  ;;  %s1937_s2 = sld [smem:[#allocation9 + $0x1d]]  ;;  %v315_v35 = vld [vmem:[#allocation7 + $0x1] ss:$8 sm:$0x3]  ;;  %v1989_v37 = vrot.slane %v291_v32, %v1967_v34  ;;  %v3173_v39 = vstv %s1901_s16  ;;  %v3172_v40 = vstv %s1903_s21  ;;  %vm771_vm9 = vcmask 130048  }
  0x86   : > { %v269_v20 = vrot.slane %v268_v16, 1  ;;  %v255_v21 = vrot.slane %v254_v17, 1  ;;  %v275_v22 = vadd.f32 %v274_v18, %v273_v14  ;;  %v261_v23 = vmax.f32 %v259_v15, %v260_v19  ;;  %3230 = sst [smem:[#allocation28_spill]] %s1903_s21  ;;  %s1941_s19 = sld [smem:[#allocation9 + $0x2b]] }
  0x87   : > { %3231 = sst [smem:[#allocation29_spill]] %s1905_s25  ;;  %s1939_s27 = sld [smem:[#allocation9 + $0x24]]  ;;  %v339_v38 = vld [vmem:[#allocation7 + $0x2] ss:$8 sm:$0x3]  ;;  %v3191_v41 = vstv %s1905_s25  ;;  %v3165_v42 = vstv %s1907_s26  ;;  %v2022_v53 = vrot.slane %v315_v35, %v1965_v33  ;;  %v2025_v54 = vrot.slane %v315_v35, %v1967_v34 }
  0x88   : > { %v1869_v24 = vadd.f32 %v269_v20, %v268_v16  ;;  %v1871_v25 = vmax.f32 %v254_v17, %v255_v21  ;;  %v276_v26 = vrot.slane %v275_v22, 1  ;;  %v262_v28 = vrot.slane %v261_v23, 1  ;;  %3232 = sst [smem:[#allocation30_spill]] %s1907_s26  ;;  %s1943_s18 = sld [smem:[#allocation9 + $0x47]] }
  0x89   : > { %3233 = sst [smem:[#allocation31_spill]] %s1909_s30  ;;  %s1945_s5 = sld [smem:[#allocation9 + $0x32]]  ;;  %v3181_v46 = vstv %s1915_s9  ;;  %v3184_v47 = vstv %s1917_s14  ;;  %v363_v55 = vld [vmem:[#allocation7 + $0x4] ss:$8 sm:$0x3]  ;;  %v2035_v59 = vrot.slane %v339_v38, %v1965_v33  ;;  %v2045_v0 = vrot.slane %v339_v38, %v1967_v34 }
  0x8a   : > { %427 = vrot.lane.b32.xlu1 %v1869_v24, %s1654_s22  ;;  %282 = vrot.lane.b32.xlu0 %v1871_v25, %s1654_s22  ;;  %v1875_v27 = vadd.f32 %v276_v26, %v275_v22  ;;  %v1879_v29 = vmax.f32 %v261_v23, %v262_v28  ;;  %3234 = sst [smem:[#allocation32_spill]] %s1911_s7  ;;  %s1947_s20 = sld [smem:[#allocation9 + $0x39]]  ;;  %v387_v60 = vld [vmem:[#allocation7 + $0x5] ss:$8 sm:$0x3]  ;;  %v2068_v10 = vrot.slane %v363_v55, %v1967_v34  ;;  %vm954_vm10 = vcmask 916480  }
  0x8b   : > { %3235 = sst [smem:[#allocation33_spill]] %s1913_s8  ;;  %s1949_s23 = sld [smem:[#allocation9 + $0x2]]  ;;  %v411_v5 = vld [vmem:[#allocation7 + $0x6] ss:$8 sm:$0x3]  ;;  %v2071_v11 = vrot.slane %v363_v55, %v1965_v33  ;;  %v2080_v14 = vrot.slane %v387_v60, %v1967_v34  ;;  %v2083_v15 = vrot.slane %v387_v60, %v1965_v33  ;;  %vm1051_vm11 = vcmask 785408  }
  0x8c   : > { %3228 = vst [vmem:[#allocation26_spill] sm:$0xff] %v1875_v27  ;;  %3236 = sst [smem:[#allocation34_spill]] %s1915_s9  ;;  %s1951_s17 = sld [smem:[#allocation9 + $0x9]]  ;;  %v2118_v30 = vrot.slane %v411_v5, %v1967_v34  ;;  %v2132_v38 = vrot.slane %v411_v5, %v1965_v33  ;;  %vm1148_vm12 = vcmask 654336  }
  0x8d   : > { %3237 = sst [smem:[#allocation35_spill]] %s1917_s14  ;;  %s1955_s28 = sld [smem:[#allocation9 + $0x3a]] }
  0x8e   : > { %305 = vrot.lane.b32.xlu0 %v1871_v25, %s1655_s24  ;;  %429 = vrot.lane.b32.xlu1 %v1875_v27, %s1654_s22  ;;  %3244 = sst [smem:[#allocation42_spill]] %s1931_s6  ;;  %s1953_s4 = sld [smem:[#allocation9 + $0x33]] }
  0x8f   : > { %3245 = sst [smem:[#allocation43_spill]] %s1933_s0  ;;  %s1959_s10 = sld [smem:[#allocation9 + $0xa]] }
  0x90   : > { %3246 = sst [smem:[#allocation44_spill]] %s1935_s1  ;;  %s1957_s15 = sld [smem:[#allocation9 + $0x3]] }
  0x91   : > { %3247 = sst [smem:[#allocation45_spill]] %s1937_s2  ;;  %s1961_s3 = sld [smem:[#allocation9 + $0x34]] }
  0x92   : > { %437 = vrot.lane.b32.xlu0 %v1869_v24, %s1655_s24  ;;  %307 = vrot.lane.b32.xlu1 %v1879_v29, %s1655_s24  ;;  %3248 = sst [smem:[#allocation46_spill]] %s1939_s27  ;;  %s2017_s21 = sld [smem:[#allocation9 + $0x11]] }
  0x93   : > { %3249 = sst [smem:[#allocation47_spill]] %s1941_s19  ;;  %s2015_s25 = sld [smem:[#allocation9 + $0x3e]] }
  0x94   : > { %3250 = sst [smem:[#allocation48_spill]] %s1943_s18  ;;  %s1963_s18 = sld [smem:[#allocation9 + $0x4]] }
  0x95   : > { %3251 = sst [smem:[#allocation49_spill]] %s1945_s5  ;;  %s2027_s8 = sld [smem:[#allocation9 + $0x42]] }
  0x96   : > { %329 = vrot.lane.b32.xlu0 %v1871_v25, %s1656_s29  ;;  %439 = vrot.lane.b32.xlu1 %v1875_v27, %s1655_s24  ;;  %s1921_s24 = sld [smem:[#allocation9 + $0x15]]  ;;  %3252 = sst [smem:[#allocation50_spill]] %s1947_s20 }
  0x97   : > { %3253 = sst [smem:[#allocation51_spill]] %s1949_s23  ;;  %s2029_s7 = sld [smem:[#allocation9 + $0x12]] }
  0x98   : > { %3254 = sst [smem:[#allocation52_spill]] %s1951_s17  ;;  %s1969_s17 = sld [smem:[#allocation9 + $0x3b]]  ;;  %v718_v60 = vstv %s2017_s21 }
  0x99   : > { %3255 = sst [smem:[#allocation53_spill]] %s1953_s4  ;;  %s1971_s4 = sld [smem:[#allocation9 + $0xb]]  ;;  %v2163_v31 = vmul.f32 %v718_v60, %v1871_v25 }
  0x9a   : > { %331 = vrot.lane.b32.xlu1 %v1879_v29, %s1656_s29  ;;  %284 = vrot.lane.b32.xlu0 %v1879_v29, %s1654_s22  ;;  %s1919_s22 = sld [smem:[#allocation9 + $0xe]]  ;;  %3257 = sst [smem:[#allocation55_spill]] %s1957_s15 }
  0x9b   : > { %3256 = sst [smem:[#allocation54_spill]] %s1955_s28  ;;  %s1973_s28 = sld [smem:[#allocation9 + $0x35]]  ;;  %v724_v28 = vstv %s2027_s8 }
  0x9c   : > { %3239 = sst [smem:[#allocation37_spill]] %s1921_s24  ;;  %v3174_v49 = vstv %s1921_s24  ;;  %s2039_s30 = sld [smem:[#allocation9 + $0x4e]]  ;;  %v2170_v34 = vmul.f32 %v724_v28, %v1869_v24 }
  0x9d   : > { %3258 = sst [smem:[#allocation56_spill]] %s1959_s10  ;;  %s1977_s15 = sld [smem:[#allocation9 + $0x5]] }
  0x9e   : > { %449 = vrot.lane.b32.xlu1 %v1875_v27, %s1656_s29  ;;  %447 = vrot.lane.b32.xlu0 %v1869_v24, %s1656_s29  ;;  %s1923_s29 = sld [smem:[#allocation9 + $0x1c]]  ;;  %3259 = sst [smem:[#allocation57_spill]] %s1961_s3 }
  0x9f   : > { %3260 = sst [smem:[#allocation58_spill]] %s1963_s18  ;;  %s1975_s10 = sld [smem:[#allocation9 + $0x40]] }
  0xa0   : > { %3238 = sst [smem:[#allocation36_spill]] %s1919_s22  ;;  %s3282_s22 = sld [smem:[#allocation57_spill]] }
  0xa1   : > { %3262 = sst [smem:[#allocation60_spill]] %s1969_s17  ;;  %s1979_s18 = sld [smem:[#allocation9 + $0x3c]] }
  0xa2   : > { %355 = vrot.lane.b32.xlu1 %v1879_v29, %s1657_s11  ;;  %353 = vrot.lane.b32.xlu0 %v1871_v25, %s1657_s11  ;;  %3263 = sst [smem:[#allocation61_spill]] %s1971_s4  ;;  %s1983_s17 = sld [smem:[#allocation9 + $0x10]] }
  0xa3   : > { %3264 = sst [smem:[#allocation62_spill]] %s1973_s28  ;;  %s1981_s3 = sld [smem:[#allocation9 + $0xc]] }
  0xa4   : > { %3240 = sst [smem:[#allocation38_spill]] %s1923_s29  ;;  %s3283_s14 = sld [smem:[#allocation56_spill]] }
  0xa5   : > { %3265 = sst [smem:[#allocation63_spill]] %s1975_s10  ;;  %s2047_s6 = sld [smem:[#allocation9 + $0x13]] }
  0xa6   : > { %459 = vrot.lane.b32.xlu1 %v1875_v27, %s1657_s11  ;;  %457 = vrot.lane.b32.xlu0 %v1869_v24, %s1657_s11  ;;  %s1925_s11 = sld [smem:[#allocation9 + $0x23]]  ;;  %3266 = sst [smem:[#allocation64_spill]] %s1977_s15  ;;  %v530_v8 = vstv %s3282_s22 }
  0xa7   : > { %3267 = sst [smem:[#allocation65_spill]] %s1979_s18  ;;  %s1991_s15 = sld [smem:[#allocation9 + $0x36]]  ;;  %v2095_v19 = vmul.f32 %v530_v8, %v1869_v24  ;;  %v2122_v32 = vmul.f32 %v530_v8, %v1875_v27 }
  0xa8   : > { %3269 = sst [smem:[#allocation67_spill]] %s1983_s17  ;;  %s1993_s18 = sld [smem:[#allocation9 + $0x3d]] }
  0xa9   : > { %3268 = sst [smem:[#allocation66_spill]] %s1981_s3  ;;  %s1999_s17 = sld [smem:[#allocation9 + $0x6]] }
  0xaa   : > { %379 = vrot.lane.b32.xlu1 %v1879_v29, %s1658_s12  ;;  %377 = vrot.lane.b32.xlu0 %v1871_v25, %s1658_s12  ;;  %s2001_s3 = sld [smem:[#allocation9 + $0x37]]  ;;  %3276 = sst [smem:[#allocation74_spill]] %s2015_s25  ;;  %v621_v9 = vstv %s3283_s14 }
  0xab   : > { %3278 = sst [smem:[#allocation75_spill]] %s2029_s7  ;;  %s2049_s0 = sld [smem:[#allocation9 + $0x1e]]  ;;  %v2099_v21 = vmul.f32 %v621_v9, %v1871_v25  ;;  %v2125_v35 = vmul.f32 %v621_v9, %v1879_v29  ;;  %v2189_v9 = vmul.f32 %v718_v60, %v1879_v29 }
  0xac   : > { %3241 = sst [smem:[#allocation39_spill]] %s1925_s11  ;;  %s3287_s9 = sld [smem:[#allocation60_spill]] }
  0xad   : > { %3270 = sst [smem:[#allocation68_spill]] %s1991_s15  ;;  %s2007_s15 = sld [smem:[#allocation9 + $0xd]] }
  0xae   : > { %469 = vrot.lane.b32.xlu1 %v1875_v27, %s1658_s12  ;;  %467 = vrot.lane.b32.xlu0 %v1869_v24, %s1658_s12  ;;  %s1927_s12 = sld [smem:[#allocation9 + $0x2a]]  ;;  %3271 = sst [smem:[#allocation69_spill]] %s1993_s18 }
  0xaf   : > { %3272 = sst [smem:[#allocation70_spill]] %s1999_s17  ;;  %s2009_s18 = sld [smem:[#allocation9 + $0x41]] }
  0xb0   : > { %3273 = sst [smem:[#allocation71_spill]] %s2001_s3  ;;  %s3280_s11 = sld [smem:[#allocation55_spill]] }
  0xb1   : > { %3281 = sst [smem:[#allocation55_spill]] %s2039_s30  ;;  %s2055_s24 = sld [smem:[#allocation9 + $0x44]] }
  0xb2   : > { %403 = vrot.lane.b32.xlu1 %v1879_v29, %s1659_s13  ;;  %401 = vrot.lane.b32.xlu0 %v1871_v25, %s1659_s13  ;;  %3284 = sst [smem:[#allocation57_spill]] %s2047_s6  ;;  %s2057_s16 = sld [smem:[#allocation9 + $0x14]]  ;;  %v627_v13 = vstv %s3287_s9 }
  0xb3   : > { %3274 = sst [smem:[#allocation72_spill]] %s2007_s15  ;;  %s2063_s2 = sld [smem:[#allocation9 + $0x45]]  ;;  %v2109_v23 = vmul.f32 %v627_v13, %v1869_v24  ;;  %v2136_v55 = vmul.f32 %v627_v13, %v1875_v27  ;;  %v2192_v13 = vmul.f32 %v724_v28, %v1875_v27 }
  0xb4   : > { %3242 = sst [smem:[#allocation40_spill]] %s1927_s12  ;;  %s2037_s12 = sld [smem:[#allocation9 + $0x43]] }
  0xb5   : > { %3275 = sst [smem:[#allocation73_spill]] %s2009_s18  ;;  %s2075_s20 = sld [smem:[#allocation9 + $0x4f]] }
  0xb6   : > { %479 = vrot.lane.b32.xlu1 %v1875_v27, %s1659_s13  ;;  %477 = vrot.lane.b32.xlu0 %v1869_v24, %s1659_s13  ;;  %s1929_s13 = sld [smem:[#allocation9 + $0x1]]  ;;  %3285 = sst [smem:[#allocation56_spill]] %s2049_s0  ;;  %v524_v7 = vstv %s3280_s11 }
  0xb7   : > { %3288 = sst [smem:[#allocation60_spill]] %s2055_s24  ;;  %s2065_s0 = sld [smem:[#allocation9 + $0x55]]  ;;  %v2092_v18 = vmul.f32 %v524_v7, %v1871_v25  ;;  %v2106_v22 = vmul.f32 %v524_v7, %v1879_v29 }
  0xb8   : > { %3289 = sst [smem:[#allocation77_spill]] %s2057_s16  ;;  %s2077_s23 = sld [smem:[#allocation9 + $0x25]] }
  0xb9   : > { %s2087_s14 = sld [smem:[#allocation9 + $0x1f]]  ;;  %s2089_s22 = sld [smem:[#allocation9 + $0x50]] }
  0xba   : > { %3279 = sst [smem:[#allocation76_spill]] %s2037_s12  ;;  %s2101_s11 = sld [smem:[#allocation9 + $0x20]] }
  0xbb   : > { %s2103_s1 = sld [smem:[#allocation9 + $0x51]]  ;;  %s3297_s27 = sld [smem:[#allocation64_spill]] }
  0xbc   : > { %3243 = sst [smem:[#allocation41_spill]] %s1929_s13  ;;  %s2113_s26 = sld [smem:[#allocation9 + $0x56]] }
  0xbd   : > { %3293 = sst [smem:[#allocation78_spill]] %s2065_s0  ;;  %s3300_s5 = sld [smem:[#allocation67_spill]] }
  0xbe   : > { %3294 = sst [smem:[#allocation79_spill]] %s2077_s23  ;;  %s2115_s29 = sld [smem:[#allocation9 + $0x5c]] }
  0xbf   : > { %s3302_s19 = sld [smem:[#allocation68_spill]]  ;;  %s2127_s10 = sld [smem:[#allocation9 + $0x21]]  ;;  %v901_v20 = vstv %s2087_s14  ;;  %v907_v17 = vstv %s2089_s22 }
  0xc0   : > { %s2129_s4 = sld [smem:[#allocation9 + $0x26]]  ;;  %s2139_s28 = sld [smem:[#allocation9 + $0x52]]  ;;  %v2208_v28 = vmul.f32 %v901_v20, %v1871_v25  ;;  %v2218_v16 = vmul.f32 %v907_v17, %v1869_v24  ;;  %v2222_v7 = vmul.f32 %v901_v20, %v1879_v29  ;;  %v2225_v5 = vmul.f32 %v907_v17, %v1875_v27 }
  0xc1   : > { %3296 = sst [smem:[#allocation80_spill]] %s2103_s1  ;;  %s2149_s1 = sld [smem:[#allocation9 + $0x53]] }
  0xc2   : > { %3299 = sst [smem:[#allocation64_spill]] %s2113_s26  ;;  %s2157_s9 = sld [smem:[#allocation9 + $0x2c]]  ;;  %3323 = vst [vmem:[#allocation92_spill] sm:$0xff] %v2218_v16  ;;  %3324 = vst [vmem:[#allocation93_spill] sm:$0xff] %v2222_v7 }
  0xc3   : > { %s2141_s26 = sld [smem:[#allocation9 + $0x57]]  ;;  %s2165_s8 = sld [smem:[#allocation9 + $0x58]]  ;;  %3325 = vst [vmem:[#allocation94_spill] sm:$0xff] %v2225_v5 }
  0xc4   : > { %3301 = sst [smem:[#allocation67_spill]] %s2115_s29  ;;  %s3304_s29 = sld [smem:[#allocation69_spill]] }
  0xc5   : > { %3303 = sst [smem:[#allocation68_spill]] %s2127_s10  ;;  %s2147_s10 = sld [smem:[#allocation9 + $0x22]] }
  0xc6   : > { %3305 = sst [smem:[#allocation69_spill]] %s2139_s28  ;;  %s2155_s21 = sld [smem:[#allocation9 + $0x27]]  ;;  %v998_v26 = vstv %s2129_s4 }
  0xc7   : > { %3306 = sst [smem:[#allocation81_spill]] %s2149_s1  ;;  %s2175_s25 = sld [smem:[#allocation9 + $0x59]]  ;;  %v2242_v3 = vmul.f32 %v998_v26, %v1871_v25  ;;  %v2253_v4 = vmul.f32 %v998_v26, %v1879_v29 }
  0xc8   : > { %3308 = sst [smem:[#allocation83_spill]] %s2157_s9  ;;  %s2167_s17 = sld [smem:[#allocation9 + $0x28]] }
  0xc9   : > { %3310 = sst [smem:[#allocation84_spill]] %s2165_s8  ;;  %s2177_s3 = sld [smem:[#allocation9 + $0x2d]]  ;;  %v1004_v12 = vstv %s2141_s26  ;;  %3330 = vst [vmem:[#allocation99_spill] sm:$0xff] %v2242_v3  ;;  %3334 = vst [vmem:[#allocation103_spill] sm:$0xff] %v2253_v4 }
  0xca   : > { %s2183_s18 = sld [smem:[#allocation9 + $0x29]]  ;;  %s2185_s15 = sld [smem:[#allocation9 + $0x5a]]  ;;  %v2245_v60 = vmul.f32 %v1004_v12, %v1869_v24  ;;  %v2261_v63 = vmul.f32 %v1004_v12, %v1875_v27 }
  0xcb   : > { %s2195_s6 = sld [smem:[#allocation9 + $0x5d]]  ;;  %s2197_s13 = sld [smem:[#allocation9 + $0x5e]] }
  0xcc   : > { %3307 = sst [smem:[#allocation82_spill]] %s2155_s21  ;;  %s3317_s14 = sld [smem:[#allocation68_spill]]  ;;  %3331 = vst [vmem:[#allocation100_spill] sm:$0xff] %v2245_v60  ;;  %3335 = vst [vmem:[#allocation104_spill] sm:$0xff] %v2261_v63 }
  0xcd   : > { %3312 = sst [smem:[#allocation86_spill]] %s2175_s25  ;;  %s2203_s24 = sld [smem:[#allocation9 + $0x2e]] }
  0xce   : > { %3311 = sst [smem:[#allocation85_spill]] %s2167_s17  ;;  %s2205_s16 = sld [smem:[#allocation9 + $0x17]] }
  0xcf   : > { %s2213_s7 = sld [smem:[#allocation9 + $0x48]]  ;;  %s2227_s23 = sld [smem:[#allocation9 + $0x5f]]  ;;  %v1095_v20 = vstv %s2177_s3 }
  0xd0   : > { %3313 = sst [smem:[#allocation87_spill]] %s2183_s18  ;;  %s2215_s0 = sld [smem:[#allocation9 + $0x18]]  ;;  %v2273_v12 = vmul.f32 %v1095_v20, %v1871_v25  ;;  %v2284_v52 = vmul.f32 %v1095_v20, %v1879_v29 }
  0xd1   : > { %3314 = sst [smem:[#allocation88_spill]] %s2185_s15  ;;  %s2229_s4 = sld [smem:[#allocation9 + $0x49]]  ;;  %v1101_v57 = vstv %s2197_s13 }
  0xd2   : > { %3316 = sst [smem:[#allocation89_spill]] %s2195_s6  ;;  %s2235_s26 = sld [smem:[#allocation9 + $0x2f]]  ;;  %3337 = vst [vmem:[#allocation105_spill] sm:$0xff] %v2273_v12  ;;  %v2281_v56 = vmul.f32 %v1101_v57, %v1869_v24  ;;  %3342 = vst [vmem:[#allocation107_spill] sm:$0xff] %v2284_v52  ;;  %v2296_v48 = vmul.f32 %v1101_v57, %v1875_v27 }
  0xd3   : > { %3318 = sst [smem:[#allocation68_spill]] %s2203_s24  ;;  %s2237_s30 = sld [smem:[#allocation9 + $0x60]] }
  0xd4   : > { %3319 = sst [smem:[#allocation90_spill]] %s2205_s16  ;;  %s2247_s28 = sld [smem:[#allocation9 + $0x30]]  ;;  %3340 = vst [vmem:[#allocation106_spill] sm:$0xff] %v2281_v56  ;;  %3347 = vst [vmem:[#allocation108_spill] sm:$0xff] %v2296_v48 }
  0xd5   : > { %3322 = sst [smem:[#allocation91_spill]] %s2213_s7  ;;  %s2249_s12 = sld [smem:[#allocation9 + $0x61]] }
  0xd6   : > { %3326 = sst [smem:[#allocation95_spill]] %s2227_s23  ;;  %s3336_s22 = sld [smem:[#allocation30_spill]]  ;;  %v815_v6 = vstv %s2215_s0 }
  0xd7   : > { %3327 = sst [smem:[#allocation96_spill]] %s2229_s4  ;;  %s3338_s3 = sld [smem:[#allocation27_spill]]  ;;  %v3178_v51 = vstv %s2229_s4  ;;  %v2299_v20 = vmul.f32 %v815_v6, %v1871_v25 }
  0xd8   : > { %3328 = sst [smem:[#allocation97_spill]] %s2235_s26  ;;  %s3339_s13 = sld [smem:[#allocation28_spill]]  ;;  %v2310_v44 = vmul.f32 %v3178_v51, %v1869_v24 }
  0xd9   : > { %3329 = sst [smem:[#allocation98_spill]] %s2237_s30  ;;  %s3341_s6 = sld [smem:[#allocation37_spill]]  ;;  %3349 = vst [vmem:[#allocation109_spill] sm:$0xff] %v2299_v20 }
  0xda   : > { %3332 = sst [smem:[#allocation101_spill]] %s2247_s28  ;;  %s3343_s16 = sld [smem:[#allocation34_spill]]  ;;  %3353 = vst [vmem:[#allocation110_spill] sm:$0xff] %v2310_v44 }
  0xdb   : > { %3333 = sst [smem:[#allocation102_spill]] %s2249_s12  ;;  %s3344_s15 = sld [smem:[#allocation35_spill]] }
  0xdc   : > { %s3345_s0 = sld [smem:[#allocation29_spill]]  ;;  %s3346_s24 = sld [smem:[#allocation36_spill]] }
  0xdd   : > { %s3348_s18 = sld [smem:[#allocation31_spill]]  ;;  %s3350_s7 = sld [smem:[#allocation32_spill]] }
  0xde   : > { %s3351_s9 = sld [smem:[#allocation33_spill]]  ;;  %s3352_s30 = sld [smem:[#allocation38_spill]] }
  0xdf   : > { %s3354_s12 = sld [smem:[#allocation39_spill]]  ;;  %s3355_s28 = sld [smem:[#allocation40_spill]] }
  0xe0   : > { %s3358_s4 = sld [smem:[#allocation41_spill]]  ;;  %s3359_s26 = sld [smem:[#allocation42_spill]] }
  0xe1   : > { %s3360_s23 = sld [smem:[#allocation43_spill]]  ;;  %s3365_s25 = sld [smem:[#allocation44_spill]] }
  0xe2   : > { %s3368_s17 = sld [smem:[#allocation45_spill]]  ;;  %s3370_s8 = sld [smem:[#allocation46_spill]] }
  0xe3   : > { %v3361_v33 = vstv %s3348_s18  ;;  %v3362_v44 = vstv %s3350_s7  ;;  %s3371_s21 = sld [smem:[#allocation47_spill]]  ;;  %s3383_s1 = sld [smem:[#allocation48_spill]]  ;;  %v3389_v63 = vstv %s3348_s18 }
  0xe4   : > { %s3397_s18 = sld [smem:[#allocation50_spill]] }
  0xe5   : > { %v3372_v48 = vstv %s3355_s28 }
  0xe6   : > { %v3375_v52 = vstv %s3359_s26 }
  0xe7   : > { %v3376_v27 = vstv %s3360_s23  ;;  %v3400_v60 = vstv %s3360_s23  ;;  %s3415_s23 = sld [smem:[#allocation53_spill]] }
  0xe8   : > { %v3411_v3 = vstv %s3370_s8 }
  0xe9   : > { %v3417_v16 = vstv %s3371_s21 }
  0xfc   : > { %v428_v62 = vpop.permute.xlu1 %427  ;;  %v2263_v61 = vpop.permute.xlu0 %282 }
  0xfd   : > { %v434_v17 = vsel %vm286_vm1, 0.0, %v428_v62  ;;  %v290_v2 = vsel %vm286_vm1, 0.0, %v2263_v61 }
  0xfe   : > { %v435_v58 = vmul.f32 %v434_v17, %v1986_v36  ;;  %v303_v8 = vmul.f32 %v1986_v36, %v290_v2 }
 0x100   : > { %v786_v17 = vmul.f32 %v3165_v42, %v435_v58  ;;  %v306_v36 = vpop.permute.xlu0 %305  ;;  %v430_v2 = vpop.permute.xlu1 %429  ;;  %v495_v1 = vmul.f32 %v3173_v39, %v435_v58  ;;  %v592_v42 = vmul.f32 %v3172_v40, %v435_v58  ;;  %v780_v26 = vmul.f32 %v3174_v49, %v303_v8 }
 0x101   : > { %v489_v57 = vmul.f32 %v3181_v46, %v303_v8  ;;  %v586_v43 = vmul.f32 %v3184_v47, %v303_v8  ;;  %v313_v25 = vsel %vm309_vm2, 0.0, %v306_v36  ;;  %v431_v45 = vsel %vm286_vm1, %v428_v62, %v430_v2 }
 0x102   : > { %v689_v50 = vmul.f32 %v3191_v41, %v435_v58  ;;  %v3356_v40 = vstv %s3346_s24  ;;  %v2322_v49 = vadd.f32 %v786_v17, %v780_v26  ;;  %v327_v24 = vmul.f32 %v2022_v53, %v313_v25 }
 0x103   : > { %v683_v39 = vmul.f32 %v3356_v40, %v303_v8  ;;  %v2327_v47 = vmul.f32 %v3361_v33, %v435_v58  ;;  %v2331_v20 = vmul.f32 %v3362_v44, %v435_v58  ;;  %v3363_v62 = vstv %s3351_s9 }
 0x104   : > { %3357 = vst [vmem:[#allocation111_spill] sm:$0xff] %v2322_v49  ;;  %v438_v51 = vpop.permute.xlu0 %437  ;;  %v308_v46 = vpop.permute.xlu1 %307  ;;  %v2335_v2 = vmul.f32 %v3363_v62, %v435_v58  ;;  %v2338_v40 = vmul.f32 %v815_v6, %v1879_v29  ;;  %v3367_v26 = vstv %s3352_s30  ;;  %v3369_v25 = vstv %s3354_s12 }
 0x105   : > { %v2342_v17 = vmul.f32 %v3367_v26, %v303_v8  ;;  %v2346_v41 = vmul.f32 %v3369_v25, %v303_v8  ;;  %v436_v33 = vmul.f32 %v431_v45, %v1989_v37  ;;  %v444_v44 = vsel %vm309_vm2, 0.0, %v438_v51 }
 0x106   : > { %3364 = vst [vmem:[#allocation112_spill] sm:$0xff] %v2335_v2  ;;  %3366 = vst [vmem:[#allocation113_spill] sm:$0xff] %v2338_v40  ;;  %v2352_v58 = vmul.f32 %v3372_v48, %v303_v8  ;;  %v310_v29 = vsel %vm309_vm2, %v306_v36, %v308_v46  ;;  %v497_v6 = vadd.f32 %v495_v1, %v489_v57  ;;  %v3374_v40 = vstv %s3358_s4 }
 0x107   : > { %v594_v62 = vadd.f32 %v592_v42, %v586_v43  ;;  %v501_v26 = vmul.f32 %v3374_v40, %v327_v24  ;;  %v598_v25 = vmul.f32 %v3375_v52, %v327_v24  ;;  %v2361_v45 = vmul.f32 %v3376_v27, %v327_v24 }
 0x108   : > { %3373 = vst [vmem:[#allocation114_spill] sm:$0xff] %v2352_v58  ;;  %v330_v56 = vpop.permute.xlu0 %329  ;;  %v440_v49 = vpop.permute.xlu1 %439  ;;  %v2363_v48 = vadd.f32 %v689_v50, %v683_v39  ;;  %v3377_v46 = vstv %s3365_s25  ;;  %v3379_v42 = vstv %s3368_s17  ;;  %v3380_v8 = vstv %s3370_s8  ;;  %s3446_s8 = sld [smem:[#allocation70_spill]] }
 0x109   : > { %v2367_v1 = vmul.f32 %v3377_v46, %v327_v24  ;;  %v2371_v43 = vmul.f32 %v3379_v42, %v327_v24  ;;  %v2375_v36 = vmul.f32 %v3380_v8, %v327_v24  ;;  %v2378_v52 = vmul.f32 %v444_v44, %v2022_v53 }
 0x10a   : > { %v3382_v27 = vstv %s3371_s21  ;;  %v3385_v40 = vstv %s3338_s3  ;;  %v328_v39 = vmul.f32 %v2025_v54, %v310_v29  ;;  %v337_v50 = vsel %vm333_vm3, 0.0, %v330_v56  ;;  %s3394_s3 = sld [smem:[#allocation49_spill]]  ;;  %s3442_s21 = sld [smem:[#allocation63_spill]] }
 0x10b   : > { %3378 = vst [vmem:[#allocation115_spill] sm:$0xff] %v2367_v1  ;;  %3381 = vst [vmem:[#allocation116_spill] sm:$0xff] %v2375_v36  ;;  %v2382_v57 = vmul.f32 %v3382_v27, %v327_v24  ;;  %v496_v12 = vmul.f32 %v3385_v40, %v436_v33  ;;  %v3386_v46 = vstv %s3339_s13  ;;  %v3387_v8 = vstv %s3345_s0  ;;  %s3466_s13 = sld [smem:[#allocation75_spill]]  ;;  %s3467_s0 = sld [smem:[#allocation76_spill]] }
 0x10c   : > { %v593_v42 = vmul.f32 %v3386_v46, %v436_v33  ;;  %v2392_v1 = vmul.f32 %v3387_v8, %v436_v33  ;;  %v3388_v53 = vstv %s3336_s22  ;;  %v2398_v24 = vmul.f32 %v3389_v63, %v436_v33  ;;  %v332_v46 = vpop.permute.xlu1 %331  ;;  %v285_v8 = vpop.permute.xlu0 %284  ;;  %s3454_s22 = sld [smem:[#allocation73_spill]] }
 0x10d   : > { %3384 = vst [vmem:[#allocation117_spill] sm:$0xff] %v2382_v57  ;;  %v787_v44 = vmul.f32 %v3388_v53, %v436_v33  ;;  %v3390_v27 = vstv %s3350_s7  ;;  %v3392_v29 = vstv %s3351_s9  ;;  %v441_v57 = vsel %vm309_vm2, %v438_v51, %v440_v49  ;;  %s3401_s7 = sld [smem:[#allocation51_spill]]  ;;  %s3405_s9 = sld [smem:[#allocation52_spill]] }
 0x10e   : > { %v2402_v40 = vmul.f32 %v3390_v27, %v436_v33  ;;  %v2406_v4 = vmul.f32 %v3392_v29, %v436_v33  ;;  %v503_v2 = vadd.f32 %v501_v26, %v497_v6  ;;  %v3395_v53 = vstv %s3383_s1 }
 0x10f   : > { %v2412_v58 = vmul.f32 %v3395_v53, %v2378_v52  ;;  %v2415_v63 = vmul.f32 %v2035_v59, %v337_v50  ;;  %v287_v33 = vsel %vm286_vm1, %v2263_v61, %v285_v8  ;;  %v600_v27 = vadd.f32 %v598_v25, %v594_v62 }
 0x110   : > { %3391 = vst [vmem:[#allocation118_spill] sm:$0xff] %v2402_v40  ;;  %3393 = vst [vmem:[#allocation119_spill] sm:$0xff] %v2406_v4  ;;  %v3398_v49 = vstv %s3358_s4  ;;  %v3399_v29 = vstv %s3359_s26  ;;  %v2425_v6 = vmul.f32 %v3400_v60, %v328_v39  ;;  %v2428_v26 = vmul.f32 %v1989_v37, %v287_v33  ;;  %s2623_s4 = sld [smem:[#allocation9 + $0x19]] }
 0x111   : > { %3396 = vst [vmem:[#allocation120_spill] sm:$0xff] %v2412_v58  ;;  %v502_v51 = vmul.f32 %v3398_v49, %v328_v39  ;;  %v599_v4 = vmul.f32 %v3399_v29, %v328_v39  ;;  %v3402_v50 = vstv %s3365_s25  ;;  %v2435_v58 = vmul.f32 %v441_v57, %v2025_v54  ;;  %s3429_s25 = sld [smem:[#allocation65_spill]]  ;;  %s3458_s26 = sld [smem:[#allocation74_spill]] }
 0x112   : > { %v2432_v53 = vmul.f32 %v3402_v50, %v328_v39  ;;  %v334_v61 = vsel %vm333_vm3, %v330_v56, %v332_v46  ;;  %v3404_v62 = vstv %s3394_s3  ;;  %v3406_v8 = vstv %s3343_s16  ;;  %v450_v50 = vpop.permute.xlu1 %449  ;;  %s3428_s16 = sld [smem:[#allocation61_spill]] }
 0x113   : > { %v507_v25 = vmul.f32 %v3404_v62, %v2378_v52  ;;  %v490_v60 = vmul.f32 %v3406_v8, %v2428_v26  ;;  %v3407_v49 = vstv %s3344_s15  ;;  %v3408_v33 = vstv %s3341_s6  ;;  %s3424_s6 = sld [smem:[#allocation58_spill]]  ;;  %s3427_s15 = sld [smem:[#allocation62_spill]] }
 0x114   : > { %3403 = vst [vmem:[#allocation121_spill] sm:$0xff] %v2432_v53  ;;  %v587_v37 = vmul.f32 %v3407_v49, %v2428_v26  ;;  %v781_v29 = vmul.f32 %v3408_v33, %v2428_v26  ;;  %v448_v53 = vpop.permute.xlu0 %447  ;;  %v3409_v54 = vstv %s3397_s18  ;;  %v3410_v56 = vstv %s3368_s17  ;;  %s3418_s17 = sld [smem:[#allocation54_spill]] }
 0x115   : > { %v604_v57 = vmul.f32 %v3409_v54, %v2378_v52  ;;  %v2455_v46 = vmul.f32 %v3410_v56, %v328_v39  ;;  %v2459_v62 = vmul.f32 %v3411_v3, %v328_v39  ;;  %v451_v8 = vsel %vm333_vm3, %v448_v53, %v450_v50 }
 0x116   : > { %v3413_v5 = vstv %s3401_s7  ;;  %v2466_v7 = vmul.f32 %v2045_v0, %v334_v61  ;;  %v2468_v33 = vadd.f32 %v787_v44, %v781_v29  ;;  %v454_v54 = vsel %vm333_vm3, 0.0, %v448_v53  ;;  %v356_v29 = vpop.permute.xlu1 %355 }
 0x117   : > { %3412 = vst [vmem:[#allocation122_spill] sm:$0xff] %v2459_v62  ;;  %v513_v49 = vmul.f32 %v3413_v5, %v2415_v63  ;;  %v3416_v56 = vstv %s3405_s9  ;;  %v2476_v3 = vmul.f32 %v3417_v16, %v328_v39  ;;  %v2479_v50 = vmul.f32 %v454_v54, %v2035_v59 }
 0x118   : > { %3414 = vst [vmem:[#allocation123_spill] sm:$0xff] %v2468_v33  ;;  %v610_v40 = vmul.f32 %v3416_v56, %v2415_v63  ;;  %v509_v5 = vadd.f32 %v507_v25, %v503_v2  ;;  %v498_v61 = vadd.f32 %v496_v12, %v490_v60  ;;  %v2482_v44 = vmul.f32 %v451_v8, %v2045_v0  ;;  %v354_v33 = vpop.permute.xlu0 %353 }
 0x119   : > { %v3419_v53 = vstv %s3394_s3  ;;  %v606_v56 = vadd.f32 %v604_v57, %v600_v27  ;;  %v595_v36 = vadd.f32 %v593_v42, %v587_v37  ;;  %v358_v16 = vsel %vm357_vm4, %v354_v33, %v356_v29  ;;  %s3469_s3 = sld [smem:[#allocation57_spill]] }
 0x11a   : > { %v508_v62 = vmul.f32 %v3419_v53, %v2435_v58  ;;  %v515_v39 = vadd.f32 %v513_v49, %v509_v5  ;;  %v3420_v59 = vstv %s3415_s23  ;;  %v504_v12 = vadd.f32 %v502_v51, %v498_v61  ;;  %v460_v51 = vpop.permute.xlu1 %459  ;;  %s3495_s23 = sld [smem:[#allocation78_spill]] }
 0x11b   : > { %v519_v2 = vmul.f32 %v3420_v59, %v2479_v50  ;;  %v361_v0 = vsel %vm357_vm4, %v356_v29, 0.0  ;;  %v3421_v25 = vstv %s3401_s7  ;;  %v612_v8 = vadd.f32 %v610_v40, %v606_v56  ;;  %s3474_s7 = sld [smem:[#allocation77_spill]] }
 0x11c   : > { %v514_v60 = vmul.f32 %v3421_v25, %v2466_v7  ;;  %v3422_v54 = vstv %s3418_s17  ;;  %v2499_v42 = vmul.f32 %v2071_v11, %v358_v16  ;;  %v510_v37 = vadd.f32 %v508_v62, %v504_v12  ;;  %v458_v5 = vpop.permute.xlu0 %457 }
 0x11d   : > { %v616_v53 = vmul.f32 %v3422_v54, %v2479_v50  ;;  %v521_v27 = vadd.f32 %v519_v2, %v515_v39  ;;  %v601_v57 = vadd.f32 %v599_v4, %v595_v36  ;;  %v3423_v49 = vstv %s3346_s24  ;;  %s3434_s24 = sld [smem:[#allocation66_spill]] }
 0x11e   : > { %v2504_v33 = vmul.f32 %v3423_v49, %v2428_v26  ;;  %v3425_v61 = vmov %v3420_v59  ;;  %v3426_v56 = vstv %s3397_s18  ;;  %v464_v16 = vsel %vm357_vm4, %v460_v51, 0.0  ;;  %s3473_s18 = sld [smem:[#allocation60_spill]] }
 0x11f   : > { %v520_v40 = vmul.f32 %v3425_v61, %v2482_v44  ;;  %v618_v29 = vadd.f32 %v616_v53, %v612_v8  ;;  %v605_v59 = vmul.f32 %v3426_v56, %v2435_v58  ;;  %v461_v4 = vsel %vm357_vm4, %v458_v5, %v460_v51 }
 0x120   : > { %v527_v36 = vadd.f32 %v2092_v18, %v521_v27  ;;  %v516_v62 = vadd.f32 %v514_v60, %v510_v37  ;;  %v2516_v39 = vmul.f32 %v2068_v10, %v361_v0  ;;  %v2519_v2 = vmul.f32 %v461_v4, %v2071_v11  ;;  %v380_v11 = vpop.permute.xlu1 %379  ;;  %v378_v27 = vpop.permute.xlu0 %377 }
 0x121   : > { %v624_v12 = vadd.f32 %v2099_v21, %v618_v29  ;;  %v607_v25 = vadd.f32 %v605_v59, %v601_v57  ;;  %v3430_v54 = vstv %s3424_s6  ;;  %v3431_v18 = vstv %s3405_s9  ;;  %s3491_s9 = sld [smem:[#allocation69_spill]]  ;;  %s3504_s6 = sld [smem:[#allocation64_spill]] }
 0x122   : > { %v533_v8 = vadd.f32 %v2095_v19, %v527_v36  ;;  %v537_v53 = vmul.f32 %v3430_v54, %v2499_v42  ;;  %v522_v49 = vadd.f32 %v520_v40, %v516_v62  ;;  %v611_v60 = vmul.f32 %v3431_v18, %v2466_v7 }
 0x123   : > { %v2530_v0 = vmul.f32 %v464_v16, %v2068_v10  ;;  %v3432_v21 = vstv %s3427_s15  ;;  %v630_v19 = vadd.f32 %v2109_v23, %v624_v12  ;;  %v3433_v57 = vstv %s3428_s16  ;;  %s1662_s15 = smov 16   ;;  %s3529_s16 = sld [smem:[#allocation67_spill]] }
 0x124   : > { %v543_v37 = vmul.f32 %v3432_v21, %v2519_v2  ;;  %v634_v51 = vmul.f32 %v3433_v57, %v2499_v42  ;;  %v385_v5 = vsel %vm381_vm5, %v380_v11, 0.0  ;;  %v382_v61 = vsel %vm381_vm5, %v378_v27, %v380_v11  ;;  %v470_v11 = vpop.permute.xlu1 %469  ;;  %v468_v27 = vpop.permute.xlu0 %467 }
 0x125   : > { %v528_v10 = vadd.f32 %v2106_v22, %v522_v49  ;;  %v3435_v40 = vstv %s3429_s25  ;;  %v2546_v56 = vmul.f32 %v2083_v15, %v382_v61  ;;  %v539_v59 = vadd.f32 %v537_v53, %v533_v8 }
 0x126   : > { %v640_v29 = vmul.f32 %v3435_v40, %v2519_v2  ;;  %v636_v23 = vadd.f32 %v634_v51, %v630_v19  ;;  %v613_v16 = vadd.f32 %v611_v60, %v607_v25  ;;  %v3436_v36 = vmov %v3430_v54 }
 0x127   : > { %v534_v4 = vadd.f32 %v2122_v32, %v528_v10  ;;  %v538_v62 = vmul.f32 %v3436_v36, %v2516_v39  ;;  %v3437_v12 = vstv %s3418_s17  ;;  %v3438_v18 = vmov %v3433_v57  ;;  %s3498_s17 = sld [smem:[#allocation79_spill]] }
 0x128   : > { %v617_v54 = vmul.f32 %v3437_v12, %v2482_v44  ;;  %v635_v22 = vmul.f32 %v3438_v18, %v2516_v39  ;;  %v2559_v49 = vmul.f32 %v2080_v14, %v385_v5  ;;  %v3439_v8 = vstv %s3297_s27 }
 0x129   : > { %v549_v25 = vmul.f32 %v3439_v8, %v2546_v56  ;;  %v3440_v32 = vmov %v3432_v21  ;;  %v3441_v60 = vstv %s3434_s24  ;;  %v474_v19 = vsel %vm381_vm5, %v470_v11, 0.0 }
 0x12a   : > { %v544_v53 = vmul.f32 %v3440_v32, %v2530_v0  ;;  %v646_v21 = vmul.f32 %v3441_v60, %v2546_v56  ;;  %v471_v57 = vsel %vm381_vm5, %v468_v27, %v470_v11  ;;  %v540_v51 = vadd.f32 %v538_v62, %v534_v4  ;;  %v404_v4 = vpop.permute.xlu1 %403 }
 0x12b   : > { %v619_v5 = vadd.f32 %v617_v54, %v613_v16  ;;  %v2573_v61 = vmul.f32 %v474_v19, %v2080_v14  ;;  %v2576_v10 = vmul.f32 %v471_v57, %v2083_v15  ;;  %v545_v40 = vadd.f32 %v543_v37, %v539_v59  ;;  %v402_v14 = vpop.permute.xlu0 %401 }
 0x12c   : > { %v642_v36 = vadd.f32 %v640_v29, %v636_v23  ;;  %v546_v12 = vadd.f32 %v544_v53, %v540_v51  ;;  %v3443_v8 = vstv %s3429_s25  ;;  %v697_v16 = vadd.f32 %v2361_v45, %v2363_v48  ;;  %s3533_s25 = sld [smem:[#allocation83_spill]] }
 0x12d   : > { %v625_v18 = vadd.f32 %v2125_v35, %v619_v5  ;;  %v641_v32 = vmul.f32 %v3443_v8, %v2530_v0  ;;  %v551_v15 = vadd.f32 %v549_v25, %v545_v40  ;;  %v3444_v62 = vstv %s3302_s19  ;;  %s3457_s19 = sld [smem:[#allocation71_spill]] }
 0x12e   : > { %v555_v37 = vmul.f32 %v3444_v62, %v2576_v10  ;;  %v3445_v29 = vstv %s3297_s27  ;;  %v648_v35 = vadd.f32 %v646_v21, %v642_v36  ;;  %v409_v23 = vsel %vm405_vm6, %v404_v4, 0.0  ;;  %s3452_s27 = sld [smem:[#allocation72_spill]] }
 0x12f   : > { %v550_v59 = vmul.f32 %v3445_v29, %v2559_v49  ;;  %v406_v54 = vsel %vm405_vm6, %v402_v14, %v404_v4  ;;  %v631_v45 = vadd.f32 %v2136_v55, %v625_v18  ;;  %v3447_v48 = vstv %s3442_s21  ;;  %v480_v18 = vpop.permute.xlu1 %479  ;;  %v478_v8 = vpop.permute.xlu0 %477 }
 0x130   : > { %v701_v11 = vmul.f32 %v3447_v48, %v2378_v52  ;;  %v2597_v27 = vmul.f32 %v2118_v30, %v409_v23  ;;  %v2600_v25 = vmul.f32 %v2132_v38, %v406_v54  ;;  %v3448_v60 = vmov %v3444_v62 }
 0x131   : > { %v552_v53 = vadd.f32 %v550_v59, %v546_v12  ;;  %v556_v21 = vmul.f32 %v3448_v60, %v2573_v61  ;;  %v3449_v19 = vstv %s3304_s29  ;;  %v637_v51 = vadd.f32 %v635_v22, %v631_v45  ;;  %s2648_s29 = sld [smem:[#allocation9 + $0x4a]] }
 0x132   : > { %v652_v57 = vmul.f32 %v3449_v19, %v2576_v10  ;;  %v3450_v5 = vstv %s3434_s24  ;;  %v3451_v40 = vstv %s3300_s5  ;;  %v557_v4 = vadd.f32 %v555_v37, %v551_v15  ;;  %s3535_s24 = sld [smem:[#allocation87_spill]] }
 0x133   : > { %v647_v55 = vmul.f32 %v3450_v5, %v2559_v49  ;;  %v707_v36 = vmul.f32 %v3451_v40, %v2415_v63  ;;  %v3453_v12 = vstv %s3446_s8  ;;  %v3456_v22 = vmov %v3449_v19  ;;  %s3541_s8 = sld [smem:[#allocation89_spill]] }
 0x134   : > { %v561_v14 = vmul.f32 %v3453_v12, %v2600_v25  ;;  %v3455_v62 = vmov %v3453_v12  ;;  %v653_v59 = vmul.f32 %v3456_v22, %v2573_v61  ;;  %v484_v23 = vsel %vm405_vm6, %v480_v18, 0.0 }
 0x135   : > { %v562_v29 = vmul.f32 %v3455_v62, %v2597_v27  ;;  %v481_v54 = vsel %vm405_vm6, %v478_v8, %v480_v18  ;;  %v643_v15 = vadd.f32 %v641_v32, %v637_v51  ;;  %v703_v37 = vadd.f32 %v701_v11, %v697_v16 }
 0x136   : > { %v2628_v45 = vmul.f32 %v484_v23, %v2118_v30  ;;  %v2631_v48 = vmul.f32 %v481_v54, %v2132_v38  ;;  %v558_v60 = vadd.f32 %v556_v21, %v552_v53  ;;  %v3459_v19 = vstv %s3452_s27  ;;  %s1663_s27 = smov 112  }
 0x137   : > { %v658_v5 = vmul.f32 %v3459_v19, %v2600_v25  ;;  %v649_v40 = vadd.f32 %v647_v55, %v643_v15  ;;  %v3460_v12 = vmov %v3459_v19  ;;  %v709_v18 = vadd.f32 %v707_v36, %v703_v37 }
 0x138   : > { %v659_v62 = vmul.f32 %v3460_v12, %v2597_v27  ;;  %v3461_v32 = vstv %s3454_s22  ;;  %v563_v30 = vadd.f32 %v561_v14, %v557_v4  ;;  %v3462_v38 = vstv %s3457_s19  ;;  %s3554_s19 = sld [smem:[#allocation95_spill]] }
 0x139   : > { %v713_v16 = vmul.f32 %v3461_v32, %v2479_v50  ;;  %v567_v11 = vmul.f32 %v3462_v38, %v2631_v48  ;;  %v564_v53 = vadd.f32 %v562_v29, %v558_v60  ;;  %v3463_v21 = vmov %v3462_v38 }
 0x13a   : > { %v568_v51 = vmul.f32 %v3463_v21, %v2628_v45  ;;  %v3464_v55 = vstv %s3383_s1  ;;  %v654_v36 = vadd.f32 %v652_v57, %v648_v35  ;;  %v3465_v22 = vstv %s3458_s26  ;;  %s1660_s1 = smov 48   ;;  %s3558_s26 = sld [smem:[#allocation97_spill]] }
 0x13b   : > { %v2653_v8 = vmul.f32 %v3464_v55, %v2435_v58  ;;  %v664_v23 = vmul.f32 %v3465_v22, %v2631_v48  ;;  %v715_v54 = vadd.f32 %v713_v16, %v709_v18  ;;  %v569_v4 = vadd.f32 %v567_v11, %v563_v30 }
 0x13c   : > { %v570_v14 = vadd.f32 %v568_v51, %v564_v53  ;;  %v655_v29 = vadd.f32 %v653_v59, %v649_v40  ;;  %v3468_v15 = vmov %v3465_v22  ;;  %v3470_v60 = vstv %s3352_s30  ;;  %s3480_s30 = sld [smem:[#allocation56_spill]] }
 0x13d   : > { %v665_v37 = vmul.f32 %v3468_v15, %v2628_v45  ;;  %v867_v19 = vmul.f32 %v3470_v60, %v2428_v26  ;;  %v3471_v12 = vstv %s3354_s12  ;;  %v3472_v57 = vstv %s3355_s28  ;;  %573 = vrot.lane.b32.xlu0 %v569_v4, %s1660_s1  ;;  %s3477_s28 = sld [smem:[#allocation55_spill]]  ;;  %s1661_s12 = smov 32  }
 0x13e   : > { %v2667_v35 = vmul.f32 %v3471_v12, %v2428_v26  ;;  %v2672_v32 = vmul.f32 %v3472_v57, %v2428_v26  ;;  %v721_v18 = vadd.f32 %v2163_v31, %v715_v54  ;;  %575 = vrot.lane.b32.xlu1 %v570_v14, %s1660_s1  ;;  %v660_v59 = vadd.f32 %v658_v5, %v654_v36  ;;  %s2895_s1 = sld [smem:[#allocation9 + $0x4b]] }
 0x13f   : > { %v661_v40 = vadd.f32 %v659_v62, %v655_v29  ;;  %v692_v16 = vadd.f32 %v2392_v1, %v2504_v33  ;;  %v827_v30 = vstv %s2623_s4  ;;  %v3475_v11 = vstv %s3466_s13  ;;  %s2881_s13 = sld [smem:[#allocation9 + $0x1a]]  ;;  %s1665_s4 = smov 80  }
 0x140   : > { %v727_v38 = vadd.f32 %v2170_v34, %v721_v18  ;;  %v731_v26 = vmul.f32 %v3475_v11, %v2499_v42  ;;  %v3476_v53 = vstv %s3467_s0  ;;  %v3478_v21 = vstv %s3469_s3  ;;  %s3562_s0 = sld [smem:[#allocation90_spill]] }
 0x141   : > { %v737_v31 = vmul.f32 %v3476_v53, %v2519_v2  ;;  %v743_v51 = vmul.f32 %v3478_v21, %v2546_v56  ;;  %v666_v5 = vadd.f32 %v664_v23, %v660_v59  ;;  %v667_v62 = vadd.f32 %v665_v37, %v661_v40 }
 0x142   : > { %v698_v1 = vadd.f32 %v2425_v6, %v692_v16  ;;  %v3479_v33 = vstv %s3442_s21  ;;  %v733_v55 = vadd.f32 %v731_v26, %v727_v38  ;;  %v3481_v36 = vstv %s3473_s18  ;;  %s3536_s21 = sld [smem:[#allocation88_spill]]  ;;  %s3570_s18 = sld [smem:[#allocation98_spill]] }
 0x143   : > { %v702_v34 = vmul.f32 %v3479_v33, %v2435_v58  ;;  %v749_v22 = vmul.f32 %v3481_v36, %v2576_v10  ;;  %v3482_v54 = vstv %s3474_s7  ;;  %v874_v23 = vadd.f32 %v2327_v47, %v2342_v17  ;;  %670 = vrot.lane.b32.xlu0 %v666_v5, %s1661_s12  ;;  %672 = vrot.lane.b32.xlu1 %v667_v62, %s1661_s12  ;;  %s3572_s7 = sld [smem:[#allocation96_spill]]  ;;  %s3583_s12 = sld [smem:[#allocation102_spill]] }
 0x144   : > { %v755_v4 = vmul.f32 %v3482_v54, %v2600_v25  ;;  %v3483_v14 = vstv %s3300_s5  ;;  %v3484_v15 = vstv %s3477_s28  ;;  %v833_v60 = vstv %s2648_s29  ;;  %s3488_s5 = sld [smem:[#allocation80_spill]]  ;;  %s1155_s29 = sld [smem:[#allocation2]] }
 0x145   : > { %v704_v6 = vadd.f32 %v702_v34, %v698_v1  ;;  %v708_v29 = vmul.f32 %v3483_v14, %v2466_v7  ;;  %v884_v37 = vmul.f32 %v3484_v15, %v2378_v52  ;;  %v739_v12 = vadd.f32 %v737_v31, %v733_v55 }
 0x146   : > { %v3485_v57 = vstv %s2063_s2  ;;  %v880_v47 = vadd.f32 %v2371_v43, %v874_v23  ;;  %v3486_v17 = vstv %s3480_s30  ;;  %v3487_v16 = vstv %s3454_s22  ;;  %s3501_s2 = sld [smem:[#allocation81_spill]]  ;;  %s3553_s22 = sld [smem:[#allocation68_spill]] }
 0x147   : > { %v761_v18 = vmul.f32 %v3485_v57, %v2631_v48  ;;  %v890_v59 = vmul.f32 %v3486_v17, %v2415_v63  ;;  %v710_v40 = vadd.f32 %v708_v29, %v704_v6  ;;  %v714_v38 = vmul.f32 %v3487_v16, %v2482_v44 }
 0x148   : > { %v732_v26 = vmul.f32 %v3475_v11, %v2516_v39  ;;  %v738_v31 = vmul.f32 %v3476_v53, %v2530_v0  ;;  %v745_v21 = vadd.f32 %v743_v51, %v739_v12  ;;  %v3489_v5 = vstv %s3469_s3  ;;  %s3569_s3 = sld [smem:[#allocation91_spill]] }
 0x149   : > { %v744_v43 = vmul.f32 %v3489_v5, %v2559_v49  ;;  %v886_v62 = vadd.f32 %v884_v37, %v880_v47  ;;  %v3490_v1 = vstv %s2075_s20  ;;  %v716_v34 = vadd.f32 %v714_v38, %v710_v40 }
 0x14a   : > { %v896_v33 = vmul.f32 %v3490_v1, %v2479_v50  ;;  %v3492_v55 = vmov %v3481_v36  ;;  %v756_v23 = vmul.f32 %v3482_v54, %v2597_v27  ;;  %v875_v6 = vadd.f32 %v2398_v24, %v867_v19 }
 0x14b   : > { %v750_v36 = vmul.f32 %v3492_v55, %v2573_v61  ;;  %v751_v51 = vadd.f32 %v749_v22, %v745_v21  ;;  %v3493_v14 = vmov %v3485_v57  ;;  %v892_v15 = vadd.f32 %v890_v59, %v886_v62 }
 0x14c   : > { %v762_v29 = vmul.f32 %v3493_v14, %v2628_v45  ;;  %v3494_v37 = vstv %s2101_s11  ;;  %v722_v57 = vadd.f32 %v2189_v9, %v716_v34  ;;  %v3496_v47 = vstv %s3488_s5 }
 0x14d   : > { %v914_v12 = vmul.f32 %v3494_v37, %v2499_v42  ;;  %v920_v17 = vmul.f32 %v3496_v47, %v2519_v2  ;;  %v881_v40 = vadd.f32 %v2455_v46, %v875_v6  ;;  %v3497_v16 = vstv %s3477_s28  ;;  %s1664_s28 = smov 96  }
 0x14e   : > { %v885_v24 = vmul.f32 %v3497_v16, %v2435_v58  ;;  %v757_v19 = vadd.f32 %v755_v4, %v751_v51  ;;  %v898_v22 = vadd.f32 %v896_v33, %v892_v15  ;;  %v3499_v59 = vstv %s3317_s14  ;;  %v3506_v51 = vld [vmem:[#allocation116_spill] sm:$0xff] }
 0x14f   : > { %v926_v38 = vmul.f32 %v3499_v59, %v2546_v56  ;;  %v3500_v11 = vstv %s3491_s9  ;;  %v728_v9 = vadd.f32 %v2192_v13, %v722_v57  ;;  %v3502_v5 = vstv %s3480_s30  ;;  %s3578_s30 = sld [smem:[#allocation101_spill]] }
 0x150   : > { %v932_v53 = vmul.f32 %v3500_v11, %v2576_v10  ;;  %v887_v21 = vadd.f32 %v885_v24, %v881_v40  ;;  %v891_v46 = vmul.f32 %v3502_v5, %v2466_v7  ;;  %v971_v62 = vadd.f32 %v2331_v20, %v2346_v41  ;;  %v3508_v41 = vld [vmem:[#allocation92_spill] sm:$0xff] }
 0x151   : > { %v763_v4 = vadd.f32 %v761_v18, %v757_v19  ;;  %v904_v1 = vadd.f32 %v2208_v28, %v898_v22  ;;  %v3503_v33 = vstv %s2075_s20  ;;  %v3505_v55 = vstv %s3495_s23  ;;  %s3515_s20 = sld [smem:[#allocation82_spill]] }
 0x152   : > { %v897_v34 = vmul.f32 %v3503_v33, %v2482_v44  ;;  %v981_v54 = vmul.f32 %v3505_v55, %v2378_v52  ;;  %v734_v13 = vadd.f32 %v732_v26, %v728_v9  ;;  %v893_v6 = vadd.f32 %v891_v46, %v887_v21 }
 0x153   : > { %v977_v14 = vadd.f32 %v3506_v51, %v971_v62  ;;  %v3507_v15 = vstv %s3498_s17  ;;  %767 = vrot.lane.b32.xlu0 %v763_v4, %s1662_s15  ;;  %v910_v28 = vadd.f32 %v3508_v41, %v904_v1  ;;  %v3509_v20 = vstv %s2147_s10  ;;  %v3516_v62 = vld [vmem:[#allocation118_spill] sm:$0xff]  ;;  %s3527_s10 = sld [smem:[#allocation86_spill]] }
 0x154   : > { %v987_v37 = vmul.f32 %v3507_v15, %v2415_v63  ;;  %v938_v18 = vmul.f32 %v3509_v20, %v2600_v25  ;;  %v3510_v57 = vstv %s3501_s2  ;;  %v3511_v47 = vstv %s2101_s11  ;;  %s3519_s11 = sld [smem:[#allocation84_spill]]  ;;  %v3521_v51 = vld [vmem:[#allocation122_spill] sm:$0xff]  ;;  %s3600_s2 = sld [smem:[#allocation25_spill]] }
 0x155   : > { %v944_v26 = vmul.f32 %v3510_v57, %v2631_v48  ;;  %v915_v40 = vmul.f32 %v3511_v47, %v2516_v39  ;;  %v740_v16 = vadd.f32 %v738_v31, %v734_v13  ;;  %v899_v24 = vadd.f32 %v897_v34, %v893_v6  ;;  %v3517_v31 = vld [vmem:[#allocation93_spill] sm:$0xff] }
 0x156   : > { %v983_v19 = vadd.f32 %v981_v54, %v977_v14  ;;  %v3512_v22 = vstv %s3504_s6  ;;  %v916_v11 = vadd.f32 %v914_v12, %v910_v28  ;;  %v3513_v9 = vstv %s3488_s5  ;;  %s2917_s5 = sld [smem:[#allocation9 + $0x1b]] }
 0x157   : > { %v993_v59 = vmul.f32 %v3512_v22, %v2479_v50  ;;  %v921_v21 = vmul.f32 %v3513_v9, %v2530_v0  ;;  %v3514_v5 = vstv %s3317_s14  ;;  %v972_v4 = vadd.f32 %v3516_v62, %v2667_v35  ;;  %s3522_s14 = sld [smem:[#allocation85_spill]] }
 0x158   : > { %v927_v46 = vmul.f32 %v3514_v5, %v2559_v49  ;;  %v746_v1 = vadd.f32 %v744_v43, %v740_v16  ;;  %v905_v33 = vadd.f32 %v3517_v31, %v899_v24  ;;  %v3518_v34 = vstv %s3491_s9  ;;  %v3524_v43 = vld [vmem:[#allocation94_spill] sm:$0xff]  ;;  %v3530_v5 = vld [vmem:[#allocation99_spill] sm:$0xff]  ;;  %s2927_s9 = sld [smem:[#allocation9 + $0x4c]] }
 0x159   : > { %v933_v55 = vmul.f32 %v3518_v34, %v2573_v61  ;;  %v989_v54 = vadd.f32 %v987_v37, %v983_v19  ;;  %v922_v12 = vadd.f32 %v920_v17, %v916_v11  ;;  %v3520_v13 = vmov %v3509_v20 }
 0x15a   : > { %v939_v6 = vmul.f32 %v3520_v13, %v2597_v27  ;;  %v978_v14 = vadd.f32 %v3521_v51, %v972_v4  ;;  %v3523_v15 = vstv %s3495_s23  ;;  %v752_v35 = vadd.f32 %v750_v36, %v746_v1  ;;  %v3538_v13 = vld [vmem:[#allocation114_spill] sm:$0xff]  ;;  %v3539_v51 = vld [vmem:[#allocation112_spill] sm:$0xff]  ;;  %s3598_s23 = sld [smem:[#allocation19_spill]] }
 0x15b   : > { %v982_v41 = vmul.f32 %v3523_v15, %v2435_v58  ;;  %v911_v28 = vadd.f32 %v3524_v43, %v905_v33  ;;  %v3525_v20 = vmov %v3510_v57  ;;  %v995_v47 = vadd.f32 %v993_v59, %v989_v54 }
 0x15c   : > { %v945_v57 = vmul.f32 %v3525_v20, %v2628_v45  ;;  %v928_v37 = vadd.f32 %v926_v38, %v922_v12  ;;  %v3526_v17 = vstv %s3515_s20  ;;  %v3528_v19 = vstv %s3498_s17  ;;  %s3599_s17 = sld [smem:[#allocation24_spill]] }
 0x15d   : > { %v1011_v16 = vmul.f32 %v3526_v17, %v2499_v42  ;;  %v984_v24 = vadd.f32 %v982_v41, %v978_v14  ;;  %v988_v22 = vmul.f32 %v3528_v19, %v2466_v7  ;;  %v758_v11 = vadd.f32 %v756_v23, %v752_v35  ;;  %v3537_v23 = vld [vmem:[#allocation100_spill] sm:$0xff] }
 0x15e   : > { %v917_v9 = vadd.f32 %v915_v40, %v911_v28  ;;  %v1001_v36 = vadd.f32 %v3530_v5, %v995_v47  ;;  %v3531_v62 = vstv %s3519_s11  ;;  %v934_v1 = vadd.f32 %v932_v53, %v928_v37 }
 0x15f   : > { %v1017_v4 = vmul.f32 %v3531_v62, %v2519_v2  ;;  %v3532_v59 = vstv %s3522_s14  ;;  %v990_v31 = vadd.f32 %v988_v22, %v984_v24  ;;  %v3534_v33 = vstv %s3504_s6 }
 0x160   : > { %v1023_v38 = vmul.f32 %v3532_v59, %v2546_v56  ;;  %v994_v34 = vmul.f32 %v3534_v33, %v2482_v44  ;;  %v764_v54 = vadd.f32 %v762_v29, %v758_v11  ;;  %v923_v12 = vadd.f32 %v921_v21, %v917_v9  ;;  %v3543_v21 = vld [vmem:[#allocation117_spill] sm:$0xff] }
 0x161   : > { %v1007_v40 = vadd.f32 %v3537_v23, %v1001_v36  ;;  %v1068_v14 = vadd.f32 %v3539_v51, %v3538_v13  ;;  %v940_v15 = vadd.f32 %v938_v18, %v934_v1  ;;  %v3540_v53 = vstv %s3527_s10 }
 0x162   : > { %v1029_v41 = vmul.f32 %v3540_v53, %v2576_v10  ;;  %v996_v35 = vadd.f32 %v994_v34, %v990_v31  ;;  %v3542_v43 = vstv %s3529_s16  ;;  %769 = vrot.lane.b32.xlu1 %v764_v54, %s1662_s15  ;;  %v929_v20 = vadd.f32 %v927_v46, %v923_v12  ;;  %s1412_s15 = sshll.u32 %s3598_s23, 7 }
 0x163   : > { %v1078_v28 = vmul.f32 %v3542_v43, %v2378_v52  ;;  %v1013_v29 = vadd.f32 %v1011_v16, %v1007_v40  ;;  %v1074_v47 = vadd.f32 %v3543_v21, %v1068_v14  ;;  %v3544_v37 = vstv %s3533_s25  ;;  %v3547_v52 = vld [vmem:[#allocation103_spill] sm:$0xff] }
 0x164   : > { %v1084_v18 = vmul.f32 %v3544_v37, %v2415_v63  ;;  %v946_v17 = vadd.f32 %v944_v26, %v940_v15  ;;  %v3545_v24 = vstv %s3535_s24  ;;  %v3546_v22 = vstv %s3536_s21  ;;  %v3549_v26 = vld [vmem:[#allocation104_spill] sm:$0xff]  ;;  %v3555_v40 = vld [vmem:[#allocation119_spill] sm:$0xff]  ;;  %s1188_s21 = scalar_lea.sflag [#allocation5], %s3599_s17 }
 0x165   : > { %v1035_v19 = vmul.f32 %v3545_v24, %v2600_v25  ;;  %v1041_v11 = vmul.f32 %v3546_v22, %v2631_v48  ;;  %v1002_v9 = vadd.f32 %v3547_v52, %v996_v35  ;;  %v935_v5 = vadd.f32 %v933_v55, %v929_v20 }
 0x166   : > { %v1019_v46 = vadd.f32 %v1017_v4, %v1013_v29  ;;  %v1080_v16 = vadd.f32 %v1078_v28, %v1074_v47  ;;  %v3548_v36 = vstv %s3541_s8  ;;  %950 = vrot.lane.b32.xlu0 %v946_v17, %s1663_s27  ;;  %v3550_v59 = vstv %s3515_s20  ;;  %s3603_s20 = sshll.u32 %s3599_s17, 3 }
 0x167   : > { %v1090_v62 = vmul.f32 %v3548_v36, %v2479_v50  ;;  %v1008_v1 = vadd.f32 %v3549_v26, %v1002_v9  ;;  %v1012_v31 = vmul.f32 %v3550_v59, %v2516_v39  ;;  %v3551_v33 = vstv %s3519_s11  ;;  %v3568_v26 = vld [vmem:[#allocation115_spill] sm:$0xff]  ;;  %v3571_v59 = vld [vmem:[#allocation106_spill] sm:$0xff]  ;;  %s241_s11 = scalar_lea.vmem [#allocation10], %s3603_s20 }
 0x168   : > { %v1018_v34 = vmul.f32 %v3551_v33, %v2530_v0  ;;  %v3552_v55 = vstv %s3522_s14  ;;  %v941_v54 = vadd.f32 %v939_v6, %v935_v5  ;;  %v1025_v12 = vadd.f32 %v1023_v38, %v1019_v46  ;;  %s1202_s14 = sshll.u32 %s241_s11, 4  ;;  %s2988_s14 = int_to_ptr.vmem [resolvable:$true] %s1202_s14 }
 0x169   : > { %v1024_v4 = vmul.f32 %v3552_v55, %v2559_v49  ;;  %v1086_v23 = vadd.f32 %v1084_v18, %v1080_v16  ;;  %v1069_v13 = vadd.f32 %v3555_v40, %v2672_v32  ;;  %v1014_v51 = vadd.f32 %v1012_v31, %v1008_v1  ;;  %v3574_v55 = vld [vmem:[#allocation121_spill] sm:$0xff]  ;;  %s1575_s8 = scalar_lea.vmem %s2988_s14, 128 }
 0x16a   : > { %v3556_v14 = vmov %v3540_v53  ;;  %v3557_v53 = vmov %v3545_v24  ;;  %v1079_v28 = vmul.f32 %v3542_v43, %v2435_v58  ;;  %v947_v20 = vadd.f32 %v945_v57, %v941_v54  ;;  %v3563_v57 = vld [vmem:[#allocation105_spill] sm:$0xff]  ;;  %p1576_p7 = scmp.ne.s32.totalorder %s2988_s14, %s1575_s8 }
 0x16b   : > { %v1030_v15 = vmul.f32 %v3556_v14, %v2573_v61  ;;  %v1036_v35 = vmul.f32 %v3557_v53, %v2597_v27  ;;  %v1031_v6 = vadd.f32 %v1029_v41, %v1025_v12  ;;  %v1092_v38 = vadd.f32 %v1090_v62, %v1086_v23  ;;  %v3567_v62 = vld [vmem:[#allocation111_spill] sm:$0xff]  ;;  %v3575_v12 = vld [vmem:[#allocation120_spill] sm:$0xff] }
 0x16c   : > { %v1075_v29 = vadd.f32 %v2476_v3, %v1069_v13  ;;  %v1020_v21 = vadd.f32 %v1018_v34, %v1014_v51  ;;  %v3559_v32 = vmov %v3546_v22  ;;  %v3560_v37 = vstv %s3553_s22  ;;  %952 = vrot.lane.b32.xlu1 %v947_v20, %s1663_s27  ;;  %v3573_v34 = vld [vmem:[#allocation123_spill] sm:$0xff]  ;;  %p1577_p12 = pnand %p1576_p7, %p1802_p10  ;;  %s1666_s27 = smov [#allocation10]  }
 0x16d   : > { %v1042_v47 = vmul.f32 %v3559_v32, %v2628_v45  ;;  %v1108_v18 = vmul.f32 %v3560_v37, %v2499_v42  ;;  %v3561_v17 = vstv %s3554_s19  ;;  %v1037_v58 = vadd.f32 %v1035_v19, %v1031_v6  ;;  %v3584_v37 = vld [vmem:[#allocation107_spill] sm:$0xff] }
 0x16e   : > { %v1114_v24 = vmul.f32 %v3561_v17, %v2519_v2  ;;  %v1098_v41 = vadd.f32 %v3563_v57, %v1092_v38  ;;  %v1081_v22 = vadd.f32 %v1079_v28, %v1075_v29  ;;  %v3564_v3 = vstv %s3533_s25  ;;  %v3581_v29 = vld [vmem:[#allocation26_spill] sm:$0xff]  ;;  %s3604_s25 = sld [smem:[#allocation127_spill]]  ;;  %p1578_p9 = pneg %p1577_p12 }
 0x16f   : > { %v1085_v52 = vmul.f32 %v3564_v3, %v2466_v7  ;;  %v1026_v9 = vadd.f32 %v1024_v4, %v1020_v21  ;;  %v3565_v5 = vstv %s3558_s26  ;;  %v3566_v16 = vmov %v3548_v36 }
 0x170   : > { %v1120_v46 = vmul.f32 %v3565_v5, %v2546_v56  ;;  %v1091_v36 = vmul.f32 %v3566_v16, %v2482_v44  ;;  %v794_v1 = vadd.f32 %v3568_v26, %v3567_v62  ;;  %v1043_v19 = vadd.f32 %v1041_v11, %v1037_v58  ;;  %v3591_v26 = vld [vmem:[#allocation109_spill] sm:$0xff] }
 0x171   : > { %v1104_v31 = vadd.f32 %v3571_v59, %v1098_v41  ;;  %v1087_v33 = vadd.f32 %v1085_v52, %v1081_v22  ;;  %v795_v4 = vadd.f32 %v3574_v55, %v3573_v34  ;;  %v1032_v54 = vadd.f32 %v1030_v15, %v1026_v9  ;;  %v3593_v34 = vld [vmem:[#allocation113_spill] sm:$0xff] }
 0x172   : > { %v800_v23 = vadd.f32 %v3575_v12, %v794_v1  ;;  %v3576_v40 = vstv %s3562_s0  ;;  %1047 = vrot.lane.b32.xlu0 %v1043_v19, %s1664_s28  ;;  %v3579_v28 = vstv %s3569_s3  ;;  %v3580_v6 = vstv %s3570_s18  ;;  %v3595_v12 = vld [vmem:[#allocation110_spill] sm:$0xff] }
 0x173   : > { %v804_v13 = vmul.f32 %v3576_v40, %v2415_v63  ;;  %v3577_v51 = vmov %v3576_v40  ;;  %v1110_v11 = vadd.f32 %v1108_v18, %v1104_v31  ;;  %v1093_v53 = vadd.f32 %v1091_v36, %v1087_v33 }
 0x174   : > { %v805_v14 = vmul.f32 %v3577_v51, %v2466_v7  ;;  %v801_v43 = vadd.f32 %v2653_v8, %v795_v4  ;;  %v810_v15 = vmul.f32 %v3579_v28, %v2479_v50  ;;  %v1038_v20 = vadd.f32 %v1036_v35, %v1032_v54  ;;  %s2986_s24 = scalar_lea.hbm %s3604_s25, %s1412_s15 }
 0x175   : > { %v1126_v63 = vmul.f32 %v3580_v6, %v2576_v10  ;;  %v806_v38 = vadd.f32 %v804_v13, %v800_v23  ;;  %v3582_v21 = vstv %s3572_s7  ;;  %v1116_v32 = vadd.f32 %v1114_v24, %v1110_v11  ;;  %v3587_v24 = vld [vmem:[#allocation108_spill] sm:$0xff] }
 0x176   : > { %v823_v7 = vmul.f32 %v3582_v21, %v3581_v29  ;;  %v1099_v18 = vadd.f32 %v3584_v37, %v1093_v53  ;;  %v807_v8 = vadd.f32 %v805_v14, %v801_v43  ;;  %v3585_v50 = vmov %v3579_v28 }
 0x177   : > { %v811_v35 = vmul.f32 %v3585_v50, %v2482_v44  ;;  %v1044_v17 = vadd.f32 %v1042_v47, %v1038_v20  ;;  %v3586_v58 = vstv %s3578_s30  ;;  %v812_v41 = vadd.f32 %v810_v15, %v806_v38 }
 0x178   : > { %v1132_v57 = vmul.f32 %v3586_v58, %v2600_v25  ;;  %v839_v22 = vstv %s2881_s13  ;;  %v1122_v3 = vadd.f32 %v1120_v46, %v1116_v32  ;;  %v1105_v52 = vadd.f32 %v3587_v24, %v1099_v18 }
 0x179   : > { %v3588_v9 = vstv %s3553_s22  ;;  %v813_v16 = vadd.f32 %v811_v35, %v807_v8  ;;  %1049 = vrot.lane.b32.xlu1 %v1044_v17, %s1664_s28  ;;  %v3589_v44 = vstv %s3583_s12  ;;  %v3590_v36 = vstv %s3554_s19  ;;  %s1579_s22 = sshll.u32 %s1666_s27, 4  ;;  %s1580_s22 = int_to_ptr.vmem [resolvable:$false] %s1579_s22 }
 0x17a   : > { %v1109_v5 = vmul.f32 %v3588_v9, %v2516_v39  ;;  %v1138_v47 = vmul.f32 %v3589_v44, %v2631_v48  ;;  %v1115_v62 = vmul.f32 %v3590_v36, %v2530_v0  ;;  %v818_v1 = vadd.f32 %v3591_v26, %v812_v41  ;;  %s1581_s19 = scalar_lea.vmem %s1580_s22, 256  ;;  %p1582_p2 = scmp.lt.s32.totalorder %s2988_s14, %s1580_s22 }
 0x17b   : > { %v845_v19 = vstv %s2895_s1  ;;  %v1128_v46 = vadd.f32 %v1126_v63, %v1122_v3  ;;  %v3592_v31 = vstv %s3558_s26  ;;  %v819_v55 = vadd.f32 %v3593_v34, %v813_v16  ;;  %p1583_p4 = scmp.lt.s32.totalorder %s1581_s19, %s1575_s8 }
 0x17c   : > { %v1111_v59 = vadd.f32 %v1109_v5, %v1105_v52  ;;  %v1121_v33 = vmul.f32 %v3592_v31, %v2559_v49  ;;  %v3594_v4 = vmov %v3580_v6  ;;  %v824_v23 = vadd.f32 %v3595_v12, %v818_v1 }
 0x17d   : > { %v1127_v54 = vmul.f32 %v3594_v4, %v2573_v61  ;;  %v828_v40 = vmul.f32 %v827_v30, %v2499_v42  ;;  %v834_v13 = vmul.f32 %v833_v60, %v2519_v2  ;;  %v1134_v51 = vadd.f32 %v1132_v57, %v1128_v46  ;;  %p1584_p6 = por %p1583_p4, %p1582_p2 }
 0x17e   : > { %v1117_v14 = vadd.f32 %v1115_v62, %v1111_v59  ;;  %v825_v11 = vadd.f32 %v823_v7, %v819_v55  ;;  %v829_v53 = vmul.f32 %v827_v30, %v2516_v39  ;;  %v3596_v43 = vmov %v3586_v58 }
 0x17f   : > { %v1133_v28 = vmul.f32 %v3596_v43, %v2597_v27  ;;  %v830_v15 = vadd.f32 %v828_v40, %v824_v23  ;;  %v840_v20 = vmul.f32 %v839_v22, %v2546_v56  ;;  %v851_v6 = vstv %s2917_s5  ;;  %p1585_p8 = pnand %p1584_p6, %p1578_p9 }
 0x180   : > { %v1140_v63 = vadd.f32 %v1138_v47, %v1134_v51  ;;  %v1123_v38 = vadd.f32 %v1121_v33, %v1117_v14  ;;  %v831_v42 = vadd.f32 %v829_v53, %v825_v11  ;;  %v835_v2 = vmul.f32 %v833_v60, %v2530_v0 }
 0x181   : > { %v3597_v29 = vmov %v3589_v44  ;;  %v836_v7 = vadd.f32 %v834_v13, %v830_v15  ;;  %v846_v32 = vmul.f32 %v845_v19, %v2576_v10  ;;  %v857_v39 = vstv %s2927_s9 }
 0x182   : > { %v1139_v21 = vmul.f32 %v3597_v29, %v2628_v45  ;;  %1144 = vrot.lane.b32.xlu0 %v1140_v63, %s1665_s4  ;;  %v1129_v30 = vadd.f32 %v1127_v54, %v1123_v38  ;;  %v837_v37 = vadd.f32 %v835_v2, %v831_v42  ;;  %v841_v56 = vmul.f32 %v839_v22, %v2559_v49 }
 0x183   : > { %v847_v18 = vmul.f32 %v845_v19, %v2573_v61  ;;  %v842_v8 = vadd.f32 %v840_v20, %v836_v7  ;;  %v852_v50 = vmul.f32 %v851_v6, %v2600_v25  ;;  %v853_v60 = vmul.f32 %v851_v6, %v2597_v27 }
 0x184   : > { %v1135_v35 = vadd.f32 %v1133_v28, %v1129_v30  ;;  %v843_v0 = vadd.f32 %v841_v56, %v837_v37  ;;  %v858_v58 = vmul.f32 %v857_v39, %v2631_v48  ;;  %v859_v41 = vmul.f32 %v857_v39, %v2628_v45  ;;  %v3602_v37 = vld [vmem:[#allocation59_spill] sm:$0xff] }
 0x185   : > { %v848_v17 = vadd.f32 %v846_v32, %v842_v8  ;;  %v1156_v43 = vstv %s1155_s29 }
 0x186   : > { %v1141_v10 = vadd.f32 %v1139_v21, %v1135_v35  ;;  %v849_v57 = vadd.f32 %v847_v18, %v843_v0 }
 0x187   : > { %v854_v3 = vadd.f32 %v852_v50, %v848_v17  ;;  %v1501_v50 = vld [vmem:[%s3600_s2] sm:$0xff] }
 0x188   : > { %1146 = vrot.lane.b32.xlu1 %v1141_v10, %s1665_s4  ;;  %v855_v24 = vadd.f32 %v853_v60, %v849_v57 }
 0x189   : > { %v860_v49 = vadd.f32 %v858_v58, %v854_v3 }
 0x18a   : > { %v861_v22 = vadd.f32 %v859_v41, %v855_v24 }
 0x1af   : > { %v574_v61 = vpop.permute.xlu0 %573 }
 0x1b0   : > { %v576_v52 = vpop.permute.xlu1 %575  ;;  %v581_v47 = vsel %vm577_vm8, 0.0, %v574_v61 }
 0x1b1   : > { %v578_v36 = vsel %vm577_vm8, %v574_v61, %v576_v52 }
 0x1b5   : > { %v671_v9 = vpop.permute.xlu0 %670  ;;  %v673_v25 = vpop.permute.xlu1 %672 }
 0x1b6   : > { %v678_v27 = vsel %vm674_vm7, 0.0, %v671_v9  ;;  %v675_v48 = vsel %vm674_vm7, %v671_v9, %v673_v25 }
 0x1b7   : > { %v679_v26 = vadd.f32 %v678_v27, %v581_v47  ;;  %v680_v1 = vadd.f32 %v675_v48, %v578_v36 }
 0x1c5   : > { %v768_v5 = vpop.permute.xlu0 %767 }
 0x1c6   : > { %v775_v45 = vsel %vm771_vm9, 0.0, %v768_v5 }
 0x1c7   : > { %v776_v46 = vadd.f32 %v775_v45, %v679_v26 }
 0x1c9   : > { %v862_v33 = vadd.f32 %v860_v49, %v776_v46 }
 0x1d4   : > { %v770_v16 = vpop.permute.xlu1 %769 }
 0x1d5   : > { %v772_v62 = vsel %vm771_vm9, %v768_v5, %v770_v16 }
 0x1d6   : > { %v777_v59 = vadd.f32 %v772_v62, %v680_v1 }
 0x1d8   : > { %v951_v44 = vpop.permute.xlu0 %950  ;;  %v863_v34 = vadd.f32 %v861_v22, %v777_v59 }
 0x1de   : > { %v953_v19 = vpop.permute.xlu1 %952 }
 0x1df   : > { %v955_v4 = vsel %vm954_vm10, %v951_v44, %v953_v19  ;;  %v958_v54 = vsel %vm954_vm10, %v953_v19, 0.0 }
 0x1e0   : > { %v959_v40 = vadd.f32 %v955_v4, %v862_v33  ;;  %v960_v13 = vadd.f32 %v958_v54, %v863_v34 }
 0x1e4   : > { %v1048_v31 = vpop.permute.xlu0 %1047 }
 0x1eb   : > { %v1050_v55 = vpop.permute.xlu1 %1049 }
 0x1ec   : > { %v1052_v12 = vsel %vm1051_vm11, %v1048_v31, %v1050_v55  ;;  %v1055_v23 = vsel %vm1051_vm11, %v1050_v55, 0.0 }
 0x1ed   : > { %v1056_v14 = vadd.f32 %v1052_v12, %v959_v40  ;;  %v1057_v11 = vadd.f32 %v1055_v23, %v960_v13 }
 0x1f4   : > { %v1145_v51 = vpop.permute.xlu0 %1144 }
 0x1fa   : > { %v1147_v53 = vpop.permute.xlu1 %1146 }
 0x1fb   : > { %v1149_v28 = vsel %vm1148_vm12, %v1145_v51, %v1147_v53  ;;  %v1152_v15 = vsel %vm1148_vm12, %v1147_v53, 0.0 }
 0x1fc   : > { %v1153_v20 = vadd.f32 %v1149_v28, %v1056_v14  ;;  %v1154_v6 = vadd.f32 %v1152_v15, %v1057_v11 }
 0x1fe   : > { %v1157_v63 = vadd.f32 %v1156_v43, %v1153_v20  ;;  %v1158_v38 = vadd.f32 %v1156_v43, %v1154_v6 }
 0x200   : > { %v1404_v42 = vmul.f32 -1.442695, %v1157_v63  ;;  %v1405_v2 = vmul.f32 -1.442695, %v1158_v38 }
 0x202   : > { %1493 = vpow2.f32 %v1404_v42 }
 0x203   : > { %1495 = vpow2.f32 %v1405_v2 }
 0x20c   : > { %v1494_v29 = vpop.eup %1493 }
 0x20d   : > { %v1496_v21 = vpop.eup %1495  ;;  %v1165_v7 = vadd.f32 1.0, %v1494_v29 }
 0x20e   : > { %v1166_v32 = vadd.f32 1.0, %v1496_v21 }
 0x20f   : > { %1497 = vrcp.f32 %v1165_v7 }
 0x210   : > { %1499 = vrcp.f32 %v1166_v32 }
 0x219   : > { %v1498_v39 = vpop.eup %1497 }
 0x21a   : > { %v1500_v30 = vpop.eup %1499  ;;  %v1174_v56 = vrot.slane %v1498_v39, %v3602_v37 }
 0x21b   : > { %v1178_v18 = vrot.slane %v1500_v30, %v3602_v37 }
 0x21d   : > { %v1181_v8 = vcombine.low %v1174_v56, %v1178_v18 }
 0x21f   : > { %v1183_v35 = vmul.f32 %v1501_v50, %v1181_v8 }
 0x221   : > { %1186 = vst [vmem:[%s241_s11] sm:$0xff] %v1183_v35 }
 0x222   : > { %1588 = shalt.err (!%p1585_p8)
}
 0x223   : > { %s1589_s26 = scalar_lea.hbm %s2986_s24, 128  ;;  %s1593_s3 = scalar_lea.hbm %s3604_s25, 256 }
 0x224   : > { %p1590_p1 = scmp.ne.s32.totalorder %s2986_s24, %s1589_s26  ;;  %p1594_p13 = scmp.lt.u32.totalorder %s2986_s24, %s3604_s25 }
 0x225   : > { %p1595_p3 = scmp.lt.u32.totalorder %s1593_s3, %s1589_s26  ;;  %p1597_p7 = scmp.lt.u32.totalorder %s1589_s26, %s2986_s24 }
 0x226   : > { %p1591_p0 = pnand %p1590_p1, %p1802_p10 }
 0x227   : > { %p1596_p5 = por %p1595_p3, %p1594_p13 }
 0x228   : > { %p1592_p11 = pneg %p1591_p0 }
 0x229   : > { %p1598_p12 = por %p1597_p7, %p1596_p5 }
 0x22b   : > { %p1599_p9 = pnand %p1598_p12, %p1592_p11 }
 0x22d   : > { %1602 = shalt.err (!%p1599_p9)
}
 0x22e   : > { %1423 = dma.vmem_to_hbm [thread:$0]  (%p1802_p10), %s2988_s14, 128, %s2986_s24, %s1188_s21  }
 0x22f PF: > { %s3605_s7 = sld [smem:[#allocation15_spill]]  ;;  %s3606_s28 = sld [smem:[#allocation20_spill]] }
 0x230   : > { %s3607_s30 = sld [smem:[#allocation18_spill]] }
 0x235   : > { %s1214_s12 = sand.u32 1, %s3605_s7   ;;  %p3608_p2 = scmp.ne.s32.totalorder %s3606_s28, 0 }
 0x236   : > { %p3609_p4 = scmp.ge.s32.totalorder %s3607_s30, 2  ;;  %s1215_s5 = scalar_lea.sflag [#allocation5], %s1214_s12 }
 0x238   : > { %p1437_p6 = pnand %p3609_p4, %p3608_p2 }
 0x23a   : > { %1632 = dma.done.wait (!%p1437_p6), %s1215_s5, 128  }
 0x23b   : > { %1634 = vsyncadd (!%p1437_p6), %s1215_s5, 4294967168  ;;  %s3610_s20 = sld [smem:[#allocation21_spill]]  ;;  %s3611_s17 = sld [smem:[#allocation16_spill]] }
 0x23c   : > { %s3612_s18 = sld [smem:[#allocation17_spill]]  ;;  %s3613_s19 = sld [smem:[#allocation22_spill]] }
 0x241   : > { %p20_p8 = scmp.ge.s32.totalorder %s3610_s20, 4  }
 0x243   :  { %22 = sbr.rel (!%p20_p8) target bundleno = 13 (0xd), region = 97 }
 0x24a   :  { %1220 = vsyncpa [#allocation4], 1 }
 0x24b   :  { %1222 = vsyncpa [#allocation4 + $0x1], 1 }
 0x24c   :  { %1223 = vsyncpa [#allocation8], 1 }
 0x24d   :  { %1224 = vsyncpa [#allocation5], 1 }
 0x24e   :  { %1226 = vsyncpa [#allocation5 + $0x1], 1 }
 0x24f   :  { %1227 = vsyncpa [#allocation6], 1 }
 0x250   :  { %1229 = vsyncpa [#allocation6 + $0x1], 1 }

</bundles_post_ra>
